<compile_context>
chip_gen: v7x
topology: tpu7x:2x2x1
jax: 0.10.0
libtpu: 0.0.40
codegen_flags: <defaults>
</compile_context>

<pallas_src>
import jax
import jax.numpy as jnp
from jax import lax
from jax.experimental import pallas as pl
from jax.experimental.pallas import tpu as pltpu


# ---------------------------------------------------------------------------
# Resident-table path: one-hot MXU gather, whole table in VMEM.
# ---------------------------------------------------------------------------
def _onehot_gather_kernel(ids_ref, tbl_ref, out_ref):
    # ids_ref: VMEM [T, 1] int32, tbl_ref: VMEM [V, H], out_ref: VMEM [T, H]
    v = tbl_ref.shape[0]
    t = ids_ref.shape[0]
    # Clamp like the XLA gather reference (emb_table[input_ids]) for invalid ids.
    ids = jnp.clip(ids_ref[...], 0, v - 1)                    # [T, 1]
    vocab_iota = lax.broadcasted_iota(jnp.int32, (t, v), 1)   # [T, V]
    one_hot = (ids == vocab_iota).astype(tbl_ref.dtype)       # exact 0/1 rows
    # HIGHEST precision => no silent bf16 demotion; the lookup is bit-exact.
    out_ref[...] = jnp.dot(
        one_hot,
        tbl_ref[...],
        precision=lax.Precision.HIGHEST,
        preferred_element_type=jnp.float32,
    ).astype(out_ref.dtype)


def _resident_pallas_call(ids2d, emb_table, token_tile, n_tiles, vmem_limit,
                          single_buffer_table):
    V, H = emb_table.shape
    n_pad = ids2d.shape[0]
    if single_buffer_table:
        # Constant index_map -> no refetch across steps -> one buffer suffices.
        table_spec = pl.BlockSpec((V, H), lambda i: (0, 0),
                                  pipeline_mode=pl.Buffered(1))
    else:
        table_spec = pl.BlockSpec((V, H), lambda i: (0, 0))
    return pl.pallas_call(
        _onehot_gather_kernel,
        out_shape=jax.ShapeDtypeStruct((n_pad, H), emb_table.dtype),
        grid=(n_tiles,),
        in_specs=[
            pl.BlockSpec((token_tile, 1), lambda i: (i, 0)),
            table_spec,
        ],
        out_specs=pl.BlockSpec((token_tile, H), lambda i: (i, 0)),
        compiler_params=pltpu.CompilerParams(
            dimension_semantics=("parallel",),
            vmem_limit_bytes=vmem_limit,
        ),
    )(ids2d, emb_table)


def _token_embedding_resident(ids_flat, emb_table, token_tile, vmem_limit):
    n = ids_flat.shape[0]
    n_tiles = -(-n // token_tile)
    n_pad = n_tiles * token_tile
    if n_pad != n:
        ids_flat = jnp.concatenate(
            [ids_flat, jnp.zeros((n_pad - n,), jnp.int32)])
    ids2d = ids_flat.reshape(n_pad, 1)
    try:
        out = _resident_pallas_call(ids2d, emb_table, token_tile, n_tiles,
                                    vmem_limit, single_buffer_table=True)
    except Exception:
        # pipeline_mode=pl.Buffered(1) support varies across JAX versions;
        # retry with default double-buffering (costs one extra table copy in
        # VMEM but is always supported).  A genuine kernel bug would re-raise
        # from this second call.
        out = _resident_pallas_call(ids2d, emb_table, token_tile, n_tiles,
                                    vmem_limit, single_buffer_table=False)
    return out[:n] if n_pad != n else out


# ---------------------------------------------------------------------------
# Large-vocab fallback: table stays in HBM, data-dependent row gather.
# ---------------------------------------------------------------------------
def _row_gather_kernel(ids_smem_ref, row_ref, out_ref):
    # row_ref: VMEM [1, H] -- table row picked by the data-dependent index_map.
    del ids_smem_ref
    out_ref[...] = row_ref[...]


def _token_embedding_row_gather(ids_flat, emb_table, vmem_limit):
    # TODO(synk): per-row DMA is latency bound; a production large-table path
    # should batch multiple rows per grid step with manual async copies.
    n = ids_flat.shape[0]
    V, H = emb_table.shape
    ids_safe = jnp.clip(ids_flat, 0, V - 1).astype(jnp.int32)
    return pl.pallas_call(
        _row_gather_kernel,
        out_shape=jax.ShapeDtypeStruct((n, H), emb_table.dtype),
        grid_spec=pltpu.PrefetchScalarGridSpec(
            num_scalar_prefetch=1,
            grid=(n,),
            in_specs=[
                pl.BlockSpec((pl.Element(1), H), lambda i, ids: (ids[i], 0)),
            ],
            out_specs=pl.BlockSpec((1, H), lambda i, ids: (i, 0)),
        ),
        compiler_params=pltpu.CompilerParams(
            dimension_semantics=("arbitrary",),
            vmem_limit_bytes=vmem_limit,
        ),
    )(ids_safe, emb_table)


# ---------------------------------------------------------------------------
# Public wrapper.
# ---------------------------------------------------------------------------
def _vmem_capacity_bytes(default_bytes=64 * 1024 * 1024):
    try:
        return int(pltpu.get_tpu_info().vmem_capacity_bytes)
    except Exception:
        return default_bytes  # conservative (v7x physical VMEM)


def token_embedding(input_ids, emb_table, *, token_tile=1024):
    """input_ids: [L, B] int; emb_table: [V, H] -> [L, B, H] == emb_table[input_ids]."""
    L, B = input_ids.shape
    V, H = emb_table.shape
    N = L * B
    ids_flat = input_ids.reshape(N).astype(jnp.int32)

    itemsize = jnp.dtype(emb_table.dtype).itemsize
    tile = N if N <= token_tile else max(8, token_tile - token_tile % 8)

    # Resident-path VMEM footprint: table (single buffer), [tile, V] one-hot
    # intermediate, double-buffered ids / output blocks.
    resident_bytes = (
        V * H * itemsize            # table (Buffered(1))
        + tile * V * 4              # one-hot intermediate
        + 2 * tile * H * itemsize   # output double buffer
        + 2 * tile * 4              # ids double buffer
    )
    vmem_cap = _vmem_capacity_bytes()            # v5e/v6e: 128 MiB, v7x: 64 MiB
    use_resident = resident_bytes <= vmem_cap // 2   # leave headroom
    vmem_limit = int(min(vmem_cap, max(2 * resident_bytes, 16 * 1024 * 1024)))

    if use_resident:
        out_flat = _token_embedding_resident(ids_flat, emb_table, tile, vmem_limit)
    else:
        out_flat = _token_embedding_row_gather(ids_flat, emb_table, vmem_limit)

    # [N, H] -> [L, B, H] is a free metadata reshape in the wrapper.
    # TODO(synk): for H not a multiple of 128, the (tile, H) output block uses
    # masked partial stores; packing into a lane-dense slab (e.g. (N/8, 8*H))
    # would speed up writeback at large N (production H>=128 needs no change).
    return out_flat.reshape(L, B, H)


if __name__ == "__main__":
    vocab_size = 256
    embedding_size = 32
    pad_token_id = 0
    initializer_range = 0.02
    seq_len = 8
    batch_size = 2

    key = jax.random.PRNGKey(0)
    k_emb, k_ids = jax.random.split(key)

    # nn.Embedding weight after TokenEmbedding._reset_parameters:
    # normal_(mean=0, std=initializer_range) over the full weight (the padding
    # row is re-randomized too, so it is not zeroed here).
    emb_table = (
        jax.random.normal(k_emb, (vocab_size, embedding_size), dtype=jnp.float32)
        * initializer_range
    )

    # input_ids: [input_ids_len, batch_size]
    input_ids = jax.random.randint(
        k_ids, (seq_len, batch_size), 0, vocab_size, dtype=jnp.int32)

    out = token_embedding(input_ids, emb_table)
    out = jax.block_until_ready(out)

    # reference: self.embedding(input_ids) -> [L, B, H]
    ref = emb_table[input_ids]

    assert out.shape == (seq_len, batch_size, embedding_size), out.shape
    assert out.dtype == emb_table.dtype
    # HIGHEST-precision one-hot matmul => the lookup is (bit-)exact.
    assert jnp.allclose(out, ref, rtol=1e-6, atol=0.0), "mismatch vs. reference"

    print("KERNEL_OK")
</pallas_src>

<mosaic_0001>
module attributes {stable_mosaic.version = 11 : i64} {
  func.func @_onehot_gather_kernel(%arg0: i32, %arg1: memref<16x1xi32, #tpu.memory_space<vmem>>, %arg2: memref<256x32xf32, #tpu.memory_space<vmem>>, %arg3: memref<16x32xf32, #tpu.memory_space<vmem>>) attributes {dimension_semantics = [#tpu.dimension_semantics<parallel>], iteration_bounds = array<i64: 1>, scalar_prefetch = 0 : i64, scratch_operands = 0 : i64, tpu.core_type = #tpu.core_type<tc>, window_params = [{transform_indices = @transform_0, window_bounds = array<i64: 16, 1>}, {pipeline_mode = #tpu.pipeline_mode<synchronous>, transform_indices = @transform_1, window_bounds = array<i64: 256, 32>}, {transform_indices = @transform_2, window_bounds = array<i64: 16, 32>}]} {
    %c0 = arith.constant 0 : index
    %c0_0 = arith.constant 0 : index
    %0 = vector.load %arg1[%c0, %c0_0] : memref<16x1xi32, #tpu.memory_space<vmem>>, vector<16x1xi32>
    %c0_i32 = arith.constant 0 : i32
    %c255_i32 = arith.constant 255 : i32
    %1 = vector.broadcast %c0_i32 : i32 to vector<16x1xi32>
    %2 = arith.maxsi %1, %0 : vector<16x1xi32>
    %3 = vector.broadcast %c255_i32 : i32 to vector<16x1xi32>
    %4 = arith.minsi %3, %2 : vector<16x1xi32>
    %5 = tpu.iota {dimensions = array<i32: 1>} : vector<16x256xi32>
    %6 = vector.broadcast %4 : vector<16x1xi32> to vector<16x256xi32>
    %7 = arith.cmpi eq, %6, %5 : vector<16x256xi32>
    %8 = arith.extui %7 : vector<16x256xi1> to vector<16x256xi32>
    %9 = arith.sitofp %8 : vector<16x256xi32> to vector<16x256xf32>
    %c0_1 = arith.constant 0 : index
    %c0_2 = arith.constant 0 : index
    %10 = vector.load %arg2[%c0_1, %c0_2] : memref<256x32xf32, #tpu.memory_space<vmem>>, vector<256x32xf32>
    %cst = arith.constant dense<0.000000e+00> : vector<16x32xf32>
    %11 = tpu.matmul %9, %10, %cst {dimension_numbers = #tpu.dot_dimension_numbers<[1], [0], [0], [1], [0, 0, 1, 1], [], []>, precision = #tpu.contract_precision<fp32>} : vector<16x256xf32>, vector<256x32xf32>, vector<16x32xf32> -> vector<16x32xf32>
    %c0_3 = arith.constant 0 : index
    %c0_4 = arith.constant 0 : index
    %12 = vector.load %arg3[%c0_3, %c0_4] : memref<16x32xf32, #tpu.memory_space<vmem>>, vector<16x32xf32>
    tpu.vector_store %arg3[%c0_3, %c0_4], %11 {strides = array<i32>} : memref<16x32xf32, #tpu.memory_space<vmem>>, vector<16x32xf32>,
    return
  }
  func.func @transform_0(%arg0: i32) -> (i32, i32) {
    %c0_i32 = arith.constant 0 : i32
    %c0_i32_0 = arith.constant 0 : i32
    return %arg0, %c0_i32 : i32, i32
  }
  func.func @transform_1(%arg0: i32) -> (i32, i32) {
    %c0_i32 = arith.constant 0 : i32
    %c0_i32_0 = arith.constant 0 : i32
    %c0_i32_1 = arith.constant 0 : i32
    return %c0_i32, %c0_i32_0 : i32, i32
  }
  func.func @transform_2(%arg0: i32) -> (i32, i32) {
    %c0_i32 = arith.constant 0 : i32
    %c0_i32_0 = arith.constant 0 : i32
    return %arg0, %c0_i32 : i32, i32
  }
}

module attributes {stable_mosaic.version = 11 : i64} {
  func.func @_onehot_gather_kernel(%arg0: i32, %arg1: memref<16x1xi32, #tpu.memory_space<vmem>>, %arg2: memref<256x32xf32, #tpu.memory_space<vmem>>, %arg3: memref<16x32xf32, #tpu.memory_space<vmem>>) attributes {dimension_semantics = [#tpu.dimension_semantics<parallel>], iteration_bounds = array<i64: 1>, scalar_prefetch = 0 : i64, scratch_operands = 0 : i64, tpu.core_type = #tpu.core_type<tc>, window_params = [{transform_indices = @transform_0, window_bounds = array<i64: 16, 1>}, {pipeline_mode = #tpu.pipeline_mode<synchronous>, transform_indices = @transform_1, window_bounds = array<i64: 256, 32>}, {transform_indices = @transform_2, window_bounds = array<i64: 16, 32>}]} {
    %c0 = arith.constant 0 : index
    %c0_0 = arith.constant 0 : index
    %0 = vector.load %arg1[%c0, %c0_0] : memref<16x1xi32, #tpu.memory_space<vmem>>, vector<16x1xi32>
    %c0_i32 = arith.constant 0 : i32
    %c255_i32 = arith.constant 255 : i32
    %1 = vector.broadcast %c0_i32 : i32 to vector<16x1xi32>
    %2 = arith.maxsi %1, %0 : vector<16x1xi32>
    %3 = vector.broadcast %c255_i32 : i32 to vector<16x1xi32>
    %4 = arith.minsi %3, %2 : vector<16x1xi32>
    %5 = tpu.iota {dimensions = array<i32: 1>} : vector<16x256xi32>
    %6 = vector.broadcast %4 : vector<16x1xi32> to vector<16x256xi32>
    %7 = arith.cmpi eq, %6, %5 : vector<16x256xi32>
    %8 = arith.extui %7 : vector<16x256xi1> to vector<16x256xi32>
    %9 = arith.sitofp %8 : vector<16x256xi32> to vector<16x256xf32>
    %c0_1 = arith.constant 0 : index
    %c0_2 = arith.constant 0 : index
    %10 = vector.load %arg2[%c0_1, %c0_2] : memref<256x32xf32, #tpu.memory_space<vmem>>, vector<256x32xf32>
    %cst = arith.constant dense<0.000000e+00> : vector<16x32xf32>
    %11 = tpu.matmul %9, %10, %cst {dimension_numbers = #tpu.dot_dimension_numbers<[1], [0], [0], [1], [0, 0, 1, 1], [], []>, precision = #tpu.contract_precision<fp32>} : vector<16x256xf32>, vector<256x32xf32>, vector<16x32xf32> -> vector<16x32xf32>
    %c0_3 = arith.constant 0 : index
    %c0_4 = arith.constant 0 : index
    %12 = vector.load %arg3[%c0_3, %c0_4] : memref<16x32xf32, #tpu.memory_space<vmem>>, vector<16x32xf32>
    tpu.vector_store %arg3[%c0_3, %c0_4], %11 {strides = array<i32>} : memref<16x32xf32, #tpu.memory_space<vmem>>, vector<16x32xf32>,
    return
  }
  func.func @transform_0(%arg0: i32) -> (i32, i32) {
    %c0_i32 = arith.constant 0 : i32
    %c0_i32_0 = arith.constant 0 : i32
    return %arg0, %c0_i32 : i32, i32
  }
  func.func @transform_1(%arg0: i32) -> (i32, i32) {
    %c0_i32 = arith.constant 0 : i32
    %c0_i32_0 = arith.constant 0 : i32
    %c0_i32_1 = arith.constant 0 : i32
    return %c0_i32, %c0_i32_0 : i32, i32
  }
  func.func @transform_2(%arg0: i32) -> (i32, i32) {
    %c0_i32 = arith.constant 0 : i32
    %c0_i32_0 = arith.constant 0 : i32
    return %arg0, %c0_i32 : i32, i32
  }
}

</mosaic_0001>

<bundles_post_ra>
// kernel: tpu_custom_call.1
= control target key start
LH: loop header
LB: loop body
LE: loop exit
PB: predicated region body
PF: predicated region fallthrough
CT: control target
= control target key end

     0   :  { %v1479_v3 = vmov 0   ;;  %s2357_s0 = inlined_call_operand.vmem [shape: s32[16,1], index: 0, kind: input, shape index: {}]   ;;  %s2358_s1 = inlined_call_operand.vmem [shape: f32[256,32], index: 1, kind: input, shape index: {}]   ;;  %s2359_s2 = inlined_call_operand.hbm [shape: f32[16,32], index: 2, kind: output, shape index: {}]  }
   0x1   :  { %v12_v0 = vld [vmem:[%s2357_s0] sm:$0xff]  ;;  %v13_v1 = vld [vmem:[%s2357_s0 + $0x8] sm:$0xff]  ;;  %1454 = vset.pattern.permute.xlu0 %v1479_v3  ;;  %v1532_v12 = vld [vmem:[%s2358_s1 + $0x90] sm:$0xff] }
   0x2   :  { %v1509_v2 = vld [vmem:[%s2358_s1 + $0x80] sm:$0xff]  ;;  %vm14_vm0 = vcmp.gt.s32.totalorder %v12_v0, 0  ;;  %vm16_vm1 = vcmp.gt.s32.totalorder %v13_v1, 0  ;;  %v1514_v4 = vld [vmem:[%s2358_s1 + $0x88] sm:$0xff]  ;;  %v1537_v13 = vld [vmem:[%s2358_s1 + $0x98] sm:$0xff]  ;;  %v130_v24 = vand.u32 4294901760, %v1532_v12 }
   0x3   :  { %v124_v5 = vand.u32 4294901760, %v1509_v2  ;;  %v1520_v6 = vld [vmem:[%s2358_s1] sm:$0xff]  ;;  %v1525_v7 = vld [vmem:[%s2358_s1 + $0x8] sm:$0xff]  ;;  %v15_v8 = vsel %vm14_vm0, %v12_v0, 0  ;;  %v17_v9 = vsel %vm16_vm1, %v13_v1, 0  ;;  %v127_v10 = vand.u32 4294901760, %v1514_v4 }
   0x4   :  { %v76_v11 = vand.u32 4294901760, %v1520_v6  ;;  %vm18_vm2 = vcmp.lt.s32.totalorder %v15_v8, 255  ;;  %vm20_vm3 = vcmp.lt.s32.totalorder %v17_v9, 255  ;;  %v79_v15 = vand.u32 4294901760, %v1525_v7  ;;  %v1548_v16 = vld [vmem:[%s2358_s1 + $0x10] sm:$0xff]  ;;  %v1553_v17 = vld [vmem:[%s2358_s1 + $0x18] sm:$0xff] }
   0x5   :  { %v1542_v14 = vsub.f32 %v1509_v2, %v124_v5  ;;  %v19_v18 = vsel %vm18_vm2, %v15_v8, 255  ;;  %v21_v19 = vsel %vm20_vm3, %v17_v9, 255  ;;  %v1556_v20 = vsub.f32 %v1514_v4, %v127_v10  ;;  %v1608_v38 = vld [vmem:[%s2358_s1 + $0xa0] sm:$0xff]  ;;  %v1618_v43 = vld [vmem:[%s2358_s1 + $0xa8] sm:$0xff] }
   0x6   :  { %v1561_v21 = vsub.f32 %v1520_v6, %v76_v11  ;;  %26 = vperm.xlu0 %1454, %v19_v18   ;;  %v1567_v23 = vsub.f32 %v1525_v7, %v79_v15  ;;  %v133_v25 = vand.u32 4294901760, %v1537_v13  ;;  %v82_v28 = vand.u32 4294901760, %v1548_v16  ;;  %v1639_v56 = vld [vmem:[%s2358_s1 + $0x20] sm:$0xff]  ;;  %v1644_v57 = vld [vmem:[%s2358_s1 + $0x28] sm:$0xff] }
   0x7   :  { %v2381_v22 = vand.u32 4294901760, %v1542_v14  ;;  %v2378_v26 = vand.u32 4294901760, %v1556_v20  ;;  %v85_v29 = vand.u32 4294901760, %v1553_v17  ;;  %v1582_v32 = vsub.f32 %v1532_v12, %v130_v24 }
   0x8   :  { %v2377_v27 = vand.u32 4294901760, %v1561_v21  ;;  %v2375_v31 = vand.u32 4294901760, %v1567_v23  ;;  %v1587_v33 = vsub.f32 %v1537_v13, %v133_v25  ;;  %v1598_v36 = vsub.f32 %v1548_v16, %v82_v28 }
   0x9   :  { %v318_v30 = vsub.f32 %v1542_v14, %v2381_v22  ;;  %v325_v34 = vsub.f32 %v1556_v20, %v2378_v26  ;;  %v1603_v37 = vsub.f32 %v1553_v17, %v85_v29  ;;  %v2374_v41 = vand.u32 4294901760, %v1582_v32 }
   0xa   :  { %v206_v35 = vsub.f32 %v1561_v21, %v2377_v27  ;;  %29 = vperm.xlu0 %1454, %v21_v19   ;;  %v213_v40 = vsub.f32 %v1567_v23, %v2375_v31  ;;  %v2372_v42 = vand.u32 4294901760, %v1587_v33  ;;  %v2371_v46 = vand.u32 4294901760, %v1598_v36 }
   0xb   :  { %v319_v39 = vand.u32 4294901760, %v318_v30  ;;  %v326_v44 = vand.u32 4294901760, %v325_v34  ;;  %v2370_v47 = vand.u32 4294901760, %v1603_v37  ;;  %v332_v49 = vsub.f32 %v1582_v32, %v2374_v41 }
   0xc   :  { %v207_v45 = vand.u32 4294901760, %v206_v35  ;;  %v214_v48 = vand.u32 4294901760, %v213_v40  ;;  %v339_v50 = vsub.f32 %v1587_v33, %v2372_v42  ;;  %v136_v51 = vand.u32 4294901760, %v1608_v38 }
   0xd   :  { %v1288_v52 = vpack.c.bf16 %v326_v44, %v319_v39  ;;  %v220_v53 = vsub.f32 %v1598_v36, %v2371_v46  ;;  %v227_v54 = vsub.f32 %v1603_v37, %v2370_v47  ;;  %v139_v55 = vand.u32 4294901760, %v1618_v43 }
   0xe   :  { %7 = vsyncpa [#allocation3], 0  ;;  %v1290_v58 = vpack.c.bf16 %v214_v48, %v207_v45  ;;  %v333_v59 = vand.u32 4294901760, %v332_v49  ;;  %v340_v60 = vand.u32 4294901760, %v339_v50  ;;  %v1649_v61 = vsub.f32 %v1608_v38, %v136_v51  ;;  %v1654_v62 = vld [vmem:[%s2358_s1 + $0xb0] sm:$0xff]  ;;  %v1668_v4 = vld [vmem:[%s2358_s1 + $0xb8] sm:$0xff] }
   0xf   :  { %1289 = vmatprep.subr.bf16.mxu1 %v1288_v52  ;;  %v221_v63 = vand.u32 4294901760, %v220_v53  ;;  %v228_v0 = vand.u32 4294901760, %v227_v54  ;;  %v1659_v1 = vsub.f32 %v1618_v43, %v139_v55  ;;  %v1663_v3 = vpack.c.bf16 %v127_v10, %v124_v5  ;;  %v1676_v30 = vld [vmem:[%s2358_s1 + $0x30] sm:$0xff]  ;;  %v1817_v43 = vld [vmem:[%s2358_s1 + $0xd8] sm:$0xff]  ;;  %v1886_v46 = vld [vmem:[%s2358_s1 + $0xe0] sm:$0xff] }
  0x10   :  { %1291 = vmatpush3.bf16.msra.mxu1 %v1290_v58  ;;  %v1292_v8 = vpack.c.bf16 %v340_v60, %v333_v59  ;;  %v2368_v9 = vand.u32 4294901760, %v1649_v61  ;;  %v88_v18 = vand.u32 4294901760, %v1639_v56  ;;  %v91_v19 = vand.u32 4294901760, %v1644_v57  ;;  %v1906_v41 = vld [vmem:[%s2358_s1 + $0xe8] sm:$0xff] }
  0x11   :  { %v1294_v2 = vpack.c.bf16 %v228_v0, %v221_v63  ;;  %v2366_v5 = vand.u32 4294901760, %v1659_v1  ;;  %1257 = vmatprep.subr.bf16.mxu0 %v1663_v3  ;;  %v1684_v10 = vpack.c.bf16 %v79_v15, %v76_v11  ;;  %v142_v34 = vand.u32 4294901760, %v1654_v62  ;;  %v1704_v11 = vld [vmem:[%s2358_s1 + $0x38] sm:$0xff]  ;;  %v1758_v63 = vld [vmem:[%s2358_s1 + $0xc8] sm:$0xff] }
  0x12   :  { %1293 = vmatprep.subr.bf16.mxu1 %v1292_v8  ;;  %v346_v35 = vsub.f32 %v1649_v61, %v2368_v9  ;;  %v1693_v39 = vsub.f32 %v1639_v56, %v88_v18  ;;  %v1698_v6 = vsub.f32 %v1644_v57, %v91_v19  ;;  %v145_v7 = vand.u32 4294901760, %v1668_v4 }
  0x13   :  { %v353_v15 = vsub.f32 %v1659_v1, %v2366_v5  ;;  %1259 = vmatpush3.bf16.msra.mxu0 %v1684_v10  ;;  %v1713_v40 = vsub.f32 %v1654_v62, %v142_v34  ;;  %v1719_v44 = vpack.c.bf16 %v133_v25, %v130_v24  ;;  %v94_v45 = vand.u32 4294901760, %v1676_v30  ;;  %v1740_v25 = vld [vmem:[%s2358_s1 + $0xc0] sm:$0xff] }
  0x14   :  { %1295 = vmatpush3.bf16.msra.mxu1 %v1294_v2  ;;  %v347_v48 = vand.u32 4294901760, %v346_v35  ;;  %v2364_v49 = vand.u32 4294901760, %v1693_v39  ;;  %v2362_v50 = vand.u32 4294901760, %v1698_v6  ;;  %v1727_v52 = vsub.f32 %v1668_v4, %v145_v7 }
  0x15   :  { %v354_v53 = vand.u32 4294901760, %v353_v15  ;;  %v2361_v12 = vand.u32 4294901760, %v1713_v40  ;;  %1261 = vmatprep.subr.bf16.mxu0 %v1719_v44  ;;  %v97_v13 = vand.u32 4294901760, %v1704_v11  ;;  %v1735_v24 = vsub.f32 %v1676_v30, %v94_v45  ;;  %v1777_v15 = vld [vmem:[%s2358_s1 + $0x40] sm:$0xff] }
  0x16   :  { %v234_v54 = vsub.f32 %v1693_v39, %v2364_v49  ;;  %v241_v58 = vsub.f32 %v1698_v6, %v2362_v50  ;;  %v2360_v59 = vand.u32 4294901760, %v1727_v52  ;;  %v1753_v60 = vpack.c.bf16 %v85_v29, %v82_v28 }
  0x17   :  { %v1296_v0 = vpack.c.bf16 %v354_v53, %v347_v48  ;;  %v360_v8 = vsub.f32 %v1713_v40, %v2361_v12  ;;  %v2363_v2 = vand.u32 4294901760, %v1735_v24  ;;  %v1767_v16 = vsub.f32 %v1704_v11, %v97_v13 }
  0x18   :  { %v235_v17 = vand.u32 4294901760, %v234_v54  ;;  %v242_v28 = vand.u32 4294901760, %v241_v58  ;;  %v367_v29 = vsub.f32 %v1727_v52, %v2360_v59  ;;  %1263 = vmatpush3.bf16.msra.mxu0 %v1753_v60  ;;  %v148_v35 = vand.u32 4294901760, %v1740_v25  ;;  %v1787_v59 = vld [vmem:[%s2358_s1 + $0x48] sm:$0xff] }
  0x19   :  { %1297 = vmatprep.subr.bf16.mxu1 %v1296_v0  ;;  %v361_v48 = vand.u32 4294901760, %v360_v8  ;;  %v248_v53 = vsub.f32 %v1735_v24, %v2363_v2  ;;  %v2365_v54 = vand.u32 4294901760, %v1767_v16  ;;  %v151_v58 = vand.u32 4294901760, %v1758_v63  ;;  %v1803_v2 = vld [vmem:[%s2358_s1 + $0xd0] sm:$0xff] }
  0x1a   :  { %v1298_v12 = vpack.c.bf16 %v242_v28, %v235_v17  ;;  %v368_v50 = vand.u32 4294901760, %v367_v29  ;;  %v1792_v0 = vsub.f32 %v1740_v25, %v148_v35  ;;  %v1798_v8 = vpack.c.bf16 %v139_v55, %v136_v51 }
  0x1b   :  { %v249_v49 = vand.u32 4294901760, %v248_v53  ;;  %v255_v17 = vsub.f32 %v1767_v16, %v2365_v54  ;;  %v1811_v28 = vsub.f32 %v1758_v63, %v151_v58  ;;  %v100_v38 = vand.u32 4294901760, %v1777_v15 }
  0x1c   :  { %1299 = vmatpush3.bf16.msra.mxu1 %v1298_v12  ;;  %v1300_v51 = vpack.c.bf16 %v368_v50, %v361_v48  ;;  %v2367_v55 = vand.u32 4294901760, %v1792_v0  ;;  %1265 = vmatprep.subr.bf16.mxu0 %v1798_v8  ;;  %v103_v29 = vand.u32 4294901760, %v1787_v59  ;;  %v1826_v53 = vpack.c.bf16 %v91_v19, %v88_v18  ;;  %v1838_v48 = vld [vmem:[%s2358_s1 + $0x50] sm:$0xff] }
  0x1d   :  { %v256_v54 = vand.u32 4294901760, %v255_v17  ;;  %v2369_v5 = vand.u32 4294901760, %v1811_v28  ;;  %v1832_v12 = vsub.f32 %v1777_v15, %v100_v38  ;;  %v2388_v50 = vand.u32 4294901760, %v1803_v2  ;;  %v1859_v17 = vld [vmem:[%s2358_s1 + $0x58] sm:$0xff] }
  0x1e   :  { %1301 = vmatprep.subr.bf16.mxu1 %v1300_v51  ;;  %v374_v56 = vsub.f32 %v1792_v0, %v2367_v55  ;;  %v1846_v57 = vsub.f32 %v1787_v59, %v103_v29  ;;  %1267 = vmatpush3.bf16.msra.mxu0 %v1826_v53  ;;  %v2387_v18 = vand.u32 4294901760, %v1817_v43  ;;  %v1854_v19 = vpack.c.bf16 %v145_v7, %v142_v34 }
  0x1f   :  { %v1302_v51 = vpack.c.bf16 %v256_v54, %v249_v49  ;;  %v381_v55 = vsub.f32 %v1811_v28, %v2369_v5  ;;  %v2373_v9 = vand.u32 4294901760, %v1832_v12  ;;  %v1868_v62 = vsub.f32 %v1803_v2, %v2388_v50 }
  0x20   :  { %2411 = vst [vmem:[#allocation5_spill] sm:$0xff] %v1854_v19  ;;  %v375_v4 = vand.u32 4294901760, %v374_v56  ;;  %v2376_v34 = vand.u32 4294901760, %v1846_v57  ;;  %v1874_v7 = vsub.f32 %v1817_v43, %v2387_v18  ;;  %1269 = vmatprep.subr.bf16.mxu0 %v1854_v19  ;;  %v2383_v49 = vand.u32 4294901760, %v1838_v48 }
  0x21   :  { %1303 = vmatpush3.bf16.msra.mxu1 %v1302_v51  ;;  %v382_v54 = vand.u32 4294901760, %v381_v55  ;;  %v262_v5 = vsub.f32 %v1832_v12, %v2373_v9  ;;  %v2380_v47 = vand.u32 4294901760, %v1868_v62  ;;  %v2382_v56 = vand.u32 4294901760, %v1859_v17 }
  0x22   :  { %v269_v42 = vsub.f32 %v1846_v57, %v2376_v34  ;;  %v2379_v51 = vand.u32 4294901760, %v1874_v7  ;;  %v1895_v55 = vsub.f32 %v1838_v48, %v2383_v49  ;;  %v1901_v9 = vpack.c.bf16 %v97_v13, %v94_v45  ;;  %v1925_v13 = vld [vmem:[%s2358_s1 + $0x60] sm:$0xff] }
  0x23   :  { %v1304_v31 = vpack.c.bf16 %v382_v54, %v375_v4  ;;  %v263_v34 = vand.u32 4294901760, %v262_v5  ;;  %v388_v27 = vsub.f32 %v1868_v62, %v2380_v47  ;;  %v1914_v26 = vsub.f32 %v1859_v17, %v2382_v56  ;;  %v1930_v4 = vld [vmem:[%s2358_s1 + $0x68] sm:$0xff] }
  0x24   :  { %2412 = vst [vmem:[#allocation6_spill] sm:$0xff] %v1901_v9  ;;  %v270_v30 = vand.u32 4294901760, %v269_v42  ;;  %v395_v11 = vsub.f32 %v1874_v7, %v2379_v51  ;;  %v2385_v45 = vand.u32 4294901760, %v1895_v55  ;;  %1271 = vmatpush3.bf16.msra.mxu0 %v1901_v9  ;;  %v2386_v5 = vand.u32 4294901760, %v1886_v46 }
  0x25   :  { %1305 = vmatprep.subr.bf16.mxu1 %v1304_v31  ;;  %v389_v42 = vand.u32 4294901760, %v388_v27  ;;  %v2384_v54 = vand.u32 4294901760, %v1914_v26  ;;  %v163_v51 = vand.u32 4294901760, %v1906_v41  ;;  %v1938_v47 = vpack.c.bf16 %v151_v58, %v148_v35  ;;  %v73_v58 = vld [vmem:[%s2358_s1 + $0xf0] sm:$0xff] }
  0x26   :  { %v1306_v22 = vpack.c.bf16 %v270_v30, %v263_v34  ;;  %v396_v56 = vand.u32 4294901760, %v395_v11  ;;  %v276_v49 = vsub.f32 %v1895_v55, %v2385_v45  ;;  %v1946_v27 = vsub.f32 %v1886_v46, %v2386_v5  ;;  %v74_v34 = vld [vmem:[%s2358_s1 + $0xf8] sm:$0xff] }
  0x27   :  { %2413 = vst [vmem:[#allocation7_spill] sm:$0xff] %v1938_v47  ;;  %v283_v31 = vsub.f32 %v1914_v26, %v2384_v54  ;;  %v1952_v25 = vsub.f32 %v1906_v41, %v163_v51  ;;  %1273 = vmatprep.subr.bf16.mxu0 %v1938_v47  ;;  %v112_v63 = vand.u32 4294901760, %v1925_v13  ;;  %v115_v35 = vand.u32 4294901760, %v1930_v4 }
  0x28   :  { %1307 = vmatpush3.bf16.msra.mxu1 %v1306_v22  ;;  %v1308_v30 = vpack.c.bf16 %v396_v56, %v389_v42  ;;  %v277_v11 = vand.u32 4294901760, %v276_v49  ;;  %v2389_v41 = vand.u32 4294901760, %v1946_v27  ;;  %v1968_v54 = vpack.c.bf16 %v103_v29, %v100_v38  ;;  %v57_v22 = vld [vmem:[%s2358_s1 + $0x70] sm:$0xff] }
  0x29   :  { %v284_v45 = vand.u32 4294901760, %v283_v31  ;;  %v2392_v5 = vand.u32 4294901760, %v1952_v25  ;;  %v1972_v18 = vsub.f32 %v1925_v13, %v112_v63  ;;  %v1975_v50 = vsub.f32 %v1930_v4, %v115_v35  ;;  %v58_v13 = vld [vmem:[%s2358_s1 + $0x78] sm:$0xff]  ;;  %s1482_s1 = smov [#allocation2]  }
  0x2a   :  { %2414 = vst [vmem:[#allocation8_spill] sm:$0xff] %v1968_v54  ;;  %1309 = vmatprep.subr.bf16.mxu1 %v1308_v30  ;;  %v402_v59 = vsub.f32 %v1946_v27, %v2389_v41  ;;  %1275 = vmatpush3.bf16.msra.mxu0 %v1968_v54  ;;  %v166_v15 = vand.u32 4294901760, %v73_v58  ;;  %v169_v38 = vand.u32 4294901760, %v74_v34  ;;  %v2415_v29 = vand.u32 4294901760, %v1803_v2  ;;  %s1001_s0 = sshll.u32 %s1482_s1, 4  ;;  %s1002_s0 = int_to_ptr.vmem [resolvable:$true] %s1001_s0 }
  0x2b   :  { %v2416_v49 = vand.u32 4294901760, %v1817_v43  ;;  %v1310_v4 = vpack.c.bf16 %v284_v45, %v277_v11  ;;  %v409_v42 = vsub.f32 %v1952_v25, %v2392_v5  ;;  %v2397_v31 = vand.u32 4294901760, %v1972_v18  ;;  %s1455_s19 = scalar_lea.vmem %s1002_s0, 256  ;;  %p1460_p1 = scmp.lt.s32.totalorder %s1002_s0, %s1002_s0 }
  0x2c   :  { %v2400_v30 = vand.u32 4294901760, %v1975_v50  ;;  %v403_v41 = vand.u32 4294901760, %v402_v59  ;;  %v1998_v54 = vsub.f32 %v73_v58, %v166_v15  ;;  %v2000_v2 = vsub.f32 %v74_v34, %v169_v38  ;;  %p1456_p0 = scmp.ne.s32.totalorder %s1002_s0, %s1455_s19  ;;  %p1461_p2 = scmp.lt.s32.totalorder %s1455_s19, %s1455_s19 }
  0x2d   :  { %v1988_v56 = vpack.c.bf16 %v2416_v49, %v2415_v29  ;;  %v118_v43 = vand.u32 4294901760, %v57_v22  ;;  %1311 = vmatpush3.bf16.msra.mxu1 %v1310_v4  ;;  %v410_v29 = vand.u32 4294901760, %v409_v42  ;;  %v290_v45 = vsub.f32 %v1972_v18, %v2397_v31 }
  0x2e   :  { %v297_v11 = vsub.f32 %v1975_v50, %v2400_v30  ;;  %v121_v49 = vand.u32 4294901760, %v58_v13  ;;  %v2404_v59 = vand.u32 4294901760, %v1998_v54  ;;  %v2403_v58 = vand.u32 4294901760, %v2000_v2  ;;  %p1462_p3 = por %p1461_p2, %p1460_p1 }
  0x2f   :  { %2417 = vst [vmem:[#allocation9_spill] sm:$0xff] %v1988_v56  ;;  %1277 = vmatprep.subr.bf16.mxu0 %v1988_v56  ;;  %v2011_v34 = vsub.f32 %v57_v22, %v118_v43  ;;  %v2418_v5 = vand.u32 4294901760, %v1838_v48  ;;  %v2419_v4 = vand.u32 4294901760, %v1859_v17  ;;  %v1312_v56 = vpack.c.bf16 %v410_v29, %v403_v41 }
  0x30   :  { %v291_v47 = vand.u32 4294901760, %v290_v45  ;;  %v298_v31 = vand.u32 4294901760, %v297_v11  ;;  %v2019_v9 = vsub.f32 %v58_v13, %v121_v49  ;;  %v416_v30 = vsub.f32 %v1998_v54, %v2404_v59  ;;  %p1463_p4 = pnand %p1462_p3, %p1456_p0 }
  0x31   :  { %v2017_v42 = vpack.c.bf16 %v2419_v4, %v2418_v5  ;;  %v423_v22 = vsub.f32 %v2000_v2, %v2403_v58  ;;  %v303_v19 = vand.u32 4294901760, %v2011_v34  ;;  %1313 = vmatprep.subr.bf16.mxu1 %v1312_v56  ;;  %v2420_v5 = vand.u32 4294901760, %v1886_v46 }
  0x32   :  { %v1314_v48 = vpack.c.bf16 %v298_v31, %v291_v47  ;;  %v310_v17 = vand.u32 4294901760, %v2019_v9  ;;  %v417_v13 = vand.u32 4294901760, %v416_v30  ;;  %v2037_v4 = vpack.c.bf16 %v115_v35, %v112_v63 }
  0x33   :  { %1279 = vmatpush3.bf16.msra.mxu0 %v2017_v42  ;;  %v2032_v41 = vpack.c.bf16 %v163_v51, %v2420_v5  ;;  %v424_v29 = vand.u32 4294901760, %v423_v22  ;;  %v304_v45 = vsub.f32 %v2011_v34, %v303_v19  ;;  %v2039_v58 = vpack.c.bf16 %v169_v38, %v166_v15 }
  0x34   :  { %1315 = vmatpush3.bf16.msra.mxu1 %v1314_v48  ;;  %v311_v11 = vsub.f32 %v2019_v9, %v310_v17  ;;  %v2041_v31 = vpack.c.bf16 %v121_v49, %v118_v43  ;;  %v1320_v46 = vpack.c.bf16 %v1556_v20, %v1542_v14  ;;  %v2426_v5 = vand.u32 4294901760, %v1587_v33 }
  0x35   :  { %1281 = vmatprep.subr.bf16.mxu0 %v2032_v41  ;;  %v1316_v47 = vpack.c.bf16 %v424_v29, %v417_v13  ;;  %v305_v56 = vand.u32 4294901760, %v304_v45  ;;  %v2422_v13 = vand.u32 4294901760, %v1556_v20  ;;  %v2428_v20 = vand.u32 4294901760, %v1603_v37 }
  0x36   :  { %v312_v51 = vand.u32 4294901760, %v311_v11  ;;  %v2423_v11 = vand.u32 4294901760, %v1561_v21  ;;  %vm993_vm8 = vcmask 261120  }
  0x37   :  { %1283 = vmatpush3.bf16.msra.mxu0 %v2037_v4  ;;  %1317 = vmatprep.subr.bf16.mxu1 %v1316_v47  ;;  %v2425_v47 = vand.u32 4294901760, %v1582_v32 }
  0x38   :  { %1285 = vmatprep.subr.bf16.mxu0 %v2039_v58  ;;  %v1318_v43 = vpack.c.bf16 %v312_v51, %v305_v56  ;;  %v2421_v51 = vand.u32 4294901760, %v1542_v14  ;;  %v2427_v14 = vand.u32 4294901760, %v1598_v36 }
  0x39   :  { %v2095_v56 = vpack.c.bf16 %v2426_v5, %v2425_v47  ;;  %v2436_v5 = vand.u32 4294901760, %v1713_v40  ;;  %v2437_v47 = vand.u32 4294901760, %v1727_v52 }
  0x3a   :  { %1319 = vmatpush3.bf16.msra.mxu1 %v1318_v43  ;;  %v2082_v29 = vpack.c.bf16 %v2422_v13, %v2421_v51  ;;  %v2424_v43 = vand.u32 4294901760, %v1567_v23  ;;  %v2101_v13 = vpack.c.bf16 %v2428_v20, %v2427_v14  ;;  %v2431_v51 = vand.u32 4294901760, %v1659_v1 }
  0x3b   :  { %1287 = vmatpush3.bf16.msra.mxu0 %v2041_v31  ;;  %1353 = vmatprep.subr.bf16.mxu1 %v1663_v3  ;;  %v2119_v38 = vpack.c.bf16 %v2437_v47, %v2436_v5  ;;  %v2439_v14 = vand.u32 4294901760, %v1735_v24  ;;  %v2440_v20 = vand.u32 4294901760, %v1767_v16  ;;  %v2448_v5 = vand.u32 4294901760, %v1868_v62 }
  0x3c   :  { %1321 = vmatprep.subr.bf16.mxu0 %v1320_v46  ;;  %v2089_v45 = vpack.c.bf16 %v2424_v43, %v2423_v11  ;;  %2429 = vst [vmem:[#allocation10_spill] sm:$0xff] %v2101_v13  ;;  %v2430_v46 = vand.u32 4294901760, %v1649_v61  ;;  %v2433_v11 = vand.u32 4294901760, %v1693_v39  ;;  %v2434_v43 = vand.u32 4294901760, %v1698_v6 }
  0x3d   :  { %2438 = vst [vmem:[#allocation13_spill] sm:$0xff] %v2119_v38  ;;  %v2125_v15 = vpack.c.bf16 %v2440_v20, %v2439_v14  ;;  %v2449_v47 = vand.u32 4294901760, %v1874_v7  ;;  %v2451_v14 = vand.u32 4294901760, %v1895_v55  ;;  %v2452_v20 = vand.u32 4294901760, %v1914_v26 }
  0x3e   :  { %v2107_v48 = vpack.c.bf16 %v2431_v51, %v2430_v46  ;;  %v2113_v49 = vpack.c.bf16 %v2434_v43, %v2433_v11  ;;  %v2442_v46 = vand.u32 4294901760, %v1792_v0  ;;  %v2443_v51 = vand.u32 4294901760, %v1811_v28 }
  0x3f   :  { %2441 = vst [vmem:[#allocation14_spill] sm:$0xff] %v2125_v15  ;;  %v2445_v11 = vand.u32 4294901760, %v1832_v12  ;;  %v2446_v43 = vand.u32 4294901760, %v1846_v57  ;;  %v2143_v22 = vpack.c.bf16 %v2449_v47, %v2448_v5  ;;  %v2149_v30 = vpack.c.bf16 %v2452_v20, %v2451_v14 }
  0x40   :  { %2432 = vst [vmem:[#allocation11_spill] sm:$0xff] %v2107_v48  ;;  %2435 = vst [vmem:[#allocation12_spill] sm:$0xff] %v2113_v49  ;;  %v2131_v35 = vpack.c.bf16 %v2443_v51, %v2442_v46  ;;  %v2454_v46 = vand.u32 4294901760, %v1946_v27  ;;  %v2455_v51 = vand.u32 4294901760, %v1952_v25  ;;  %v2460_v5 = vand.u32 4294901760, %v1998_v54 }
  0x41   :  { %v2137_v63 = vpack.c.bf16 %v2446_v43, %v2445_v11  ;;  %2450 = vst [vmem:[#allocation17_spill] sm:$0xff] %v2143_v22  ;;  %2453 = vst [vmem:[#allocation18_spill] sm:$0xff] %v2149_v30  ;;  %v2457_v11 = vand.u32 4294901760, %v1972_v18  ;;  %v2458_v43 = vand.u32 4294901760, %v1975_v50  ;;  %v2461_v47 = vand.u32 4294901760, %v2000_v2 }
  0x42   :  { %2444 = vst [vmem:[#allocation15_spill] sm:$0xff] %v2131_v35  ;;  %v2155_v59 = vpack.c.bf16 %v2455_v51, %v2454_v46  ;;  %v2169_v14 = vpack.c.bf16 %v310_v17, %v303_v19  ;;  %v22_v20 = vlaneseq }
  0x43   :  { %2447 = vst [vmem:[#allocation16_spill] sm:$0xff] %v2137_v63  ;;  %v2161_v63 = vpack.c.bf16 %v2458_v43, %v2457_v11  ;;  %v2167_v22 = vpack.c.bf16 %v2461_v47, %v2460_v5  ;;  %v1480_v11 = vmov 0.0   ;;  %v2405_v43 = vmov 1.0  }
  0x44   :  { %2456 = vst [vmem:[#allocation19_spill] sm:$0xff] %v2155_v59  ;;  %2463 = vst [vmem:[#allocation22_spill] sm:$0xff] %v2169_v14  ;;  %v2171_v30 = vand.u32 127, %v22_v20 }
  0x45   :  { %2459 = vst [vmem:[#allocation20_spill] sm:$0xff] %v2161_v63  ;;  %2462 = vst [vmem:[#allocation21_spill] sm:$0xff] %v2167_v22  ;;  %v2466_v22 = vmov 1.0  }
  0x46   :  { %2464 = vst [vmem:[#allocation23_spill] sm:$0xff] %v2171_v30  ;;  %v2174_v46 = vadd.s32 128, %v2171_v30 }
  0x85   :  { %v2176_v51 = vpop.permute.xlu0 %26 }
  0x86   :  { %vm31_vm4 = vcmp.eq.s32.totalorder %v2176_v51, %v2171_v30  ;;  %vm32_vm5 = vcmp.eq.s32.totalorder %v2176_v51, %v2174_v46 }
  0x87   :  { %v1012_v19 = vsel %vm31_vm4, 1.0, %v1480_v11  ;;  %v1013_v17 = vsel %vm32_vm5, 1.0, %v1480_v11  ;;  %1016 = vmatprep.mubr.msk.f32.mxu1 %vm32_vm5, %v2405_v43 }
  0x88   :  { %v172_v5 = vsub.f32 %v1013_v17, %v1013_v17  ;;  %v2192_v47 = vsub.f32 %v1012_v19, %v1012_v19  ;;  %1017 = vmatmul.mubr.msk.f32.vlgmr.msra.gmra.mrb[0].mxu1 %vm31_vm4, %v2405_v43 }
  0x89   :  { %1355 = vmatpush3.bf16.msra.mxu1 %v1684_v10  ;;  %v2199_v20 = vpop.permute.xlu0 %29 }
  0x8a   :  { %2465 = vst [vmem:[#allocation24_spill] sm:$0xff] %v2199_v20  ;;  %vm33_vm6 = vcmp.eq.s32.totalorder %v2199_v20, %v2171_v30  ;;  %vm34_vm7 = vcmp.eq.s32.totalorder %v2199_v20, %v2174_v46  ;;  %1357 = vmatprep.subr.bf16.mxu1 %v1719_v44  ;;  %v173_v17 = vand.u32 4294901760, %v172_v5  ;;  %v179_v19 = vand.u32 4294901760, %v2192_v47  ;;  %v2468_v30 = vld [vmem:[#allocation5_spill] sm:$0xff] }
  0x8b   :  { %v1014_v14 = vsel %vm33_vm6, 1.0, %v1480_v11  ;;  %v1015_v43 = vsel %vm34_vm7, 1.0, %v1480_v11  ;;  %1018 = vmatprep.mubr.msk.f32.mxu1 %vm34_vm7, %v2466_v22  ;;  %v2467_v20 = vpack.c.bf16 %v1567_v23, %v1561_v21  ;;  %v2473_v21 = vpack.c.bf16 %v1659_v1, %v1649_v61  ;;  %v2474_v23 = vld [vmem:[#allocation8_spill] sm:$0xff] }
  0x8c   :  { %v187_v63 = vsub.f32 %v1015_v43, %v1015_v43  ;;  %v193_v59 = vsub.f32 %v1014_v14, %v1014_v14  ;;  %1019 = vmatmul.mubr.msk.f32.gmra.mrb[2].mxu1 %vm33_vm6, %v2466_v22  ;;  %v174_v35 = vsub.f32 %v172_v5, %v173_v17  ;;  %v180_v15 = vsub.f32 %v2192_v47, %v179_v19 }
  0x8d   :  { %1359 = vmatpush3.bf16.msra.mxu1 %v1753_v60  ;;  %687 = vmatprep.mubr.f32.mxu1 %v173_v17  ;;  %v2480_v61 = vpack.c.bf16 %v1846_v57, %v1832_v12  ;;  %v2481_v1 = vpack.c.bf16 %v1874_v7, %v1868_v62  ;;  %v2500_v57 = vld [vmem:[#allocation21_spill] sm:$0xff] }
  0x8e   :  { %1361 = vmatprep.subr.bf16.mxu1 %v1798_v8  ;;  %v175_v11 = vand.u32 4294901760, %v174_v35  ;;  %v181_v38 = vand.u32 4294901760, %v180_v15  ;;  %v188_v49 = vand.u32 4294901760, %v187_v63  ;;  %v194_v48 = vand.u32 4294901760, %v193_v59  ;;  %v2470_v15 = vld [vmem:[#allocation6_spill] sm:$0xff] }
  0x8f   :  { %v2469_v35 = vpack.c.bf16 %v1587_v33, %v1582_v32  ;;  %v2475_v32 = vpack.c.bf16 %v1698_v6, %v1693_v39  ;;  %v2476_v33 = vld [vmem:[#allocation9_spill] sm:$0xff]  ;;  %v2482_v39 = vpack.c.bf16 %v1914_v26, %v1895_v55  ;;  %v2483_v6 = vpack.c.bf16 %v1952_v25, %v1946_v27 }
  0x90   :  { %176 = vmatprep.mubr.f32.mxu0 %v175_v11  ;;  %v189_v43 = vsub.f32 %v187_v63, %v188_v49  ;;  %v195_v14 = vsub.f32 %v193_v59, %v194_v48  ;;  %v2471_v11 = vpack.c.bf16 %v1603_v37, %v1598_v36  ;;  %v2478_v36 = vpack.c.bf16 %v1767_v16, %v1735_v24  ;;  %v2491_v24 = vld [vmem:[#allocation14_spill] sm:$0xff]  ;;  %v2493_v16 = vld [vmem:[#allocation16_spill] sm:$0xff] }
  0x91   :  { %1363 = vmatpush3.bf16.msra.mxu1 %v1826_v53  ;;  %182 = vmatmul.mubr.f32.vlgmr.msra.gmra.mrb[0].mxu0 %v181_v38  ;;  %v2472_v38 = vld [vmem:[#allocation7_spill] sm:$0xff]  ;;  %v2479_v37 = vpack.c.bf16 %v1811_v28, %v1792_v0  ;;  %v2485_v26 = vpack.c.bf16 %v2000_v2, %v1998_v54  ;;  %v2494_v0 = vld [vmem:[#allocation17_spill] sm:$0xff] }
  0x92   :  { %1323 = vmatpush3.bf16.msra.mxu0 %v2467_v20  ;;  %1365 = vmatprep.subr.bf16.mxu1 %v2468_v30  ;;  %v190_v13 = vand.u32 4294901760, %v189_v43  ;;  %v196_v17 = vand.u32 4294901760, %v195_v14  ;;  %v2496_v28 = vld [vmem:[#allocation19_spill] sm:$0xff] }
  0x93   :  { %1325 = vmatprep.subr.bf16.mxu0 %v2469_v35 }
  0x94   :  { %191 = vmatprep.mubr.f32.mxu0 %v190_v13  ;;  %v2477_v13 = vpack.c.bf16 %v1727_v52, %v1713_v40  ;;  %v2484_v40 = vpack.c.bf16 %v1975_v50, %v1972_v18  ;;  %v2490_v52 = vld [vmem:[#allocation13_spill] sm:$0xff]  ;;  %v2499_v50 = vld [vmem:[#allocation20_spill] sm:$0xff]  ;;  %v2501_v18 = vld [vmem:[#allocation22_spill] sm:$0xff] }
  0x95   :  { %1367 = vmatpush3.bf16.msra.mxu1 %v2470_v15  ;;  %197 = vmatmul.mubr.f32.gmra.mrb[2].mxu0 %v196_v17 }
  0x96   :  { %1327 = vmatpush3.bf16.msra.mxu0 %v2471_v11  ;;  %571 = vmatprep.mubr.f32.mxu0 %v172_v5 }
  0x97   :  { %1369 = vmatprep.subr.bf16.mxu1 %v2472_v38  ;;  %1329 = vmatprep.subr.bf16.mxu0 %v2473_v21 }
  0x99   :  { %1371 = vmatpush3.bf16.msra.mxu1 %v2474_v23 }
  0x9a   :  { %1331 = vmatpush3.bf16.msra.mxu0 %v2475_v32  ;;  %1373 = vmatprep.subr.bf16.mxu1 %v2476_v33 }
  0x9b   :  { %1333 = vmatprep.subr.bf16.mxu0 %v2477_v13 }
  0x9d   :  { %1375 = vmatpush3.bf16.msra.mxu1 %v2017_v42 }
  0x9e   :  { %1335 = vmatpush3.bf16.msra.mxu0 %v2478_v36  ;;  %1377 = vmatprep.subr.bf16.mxu1 %v2032_v41 }
  0x9f   :  { %1337 = vmatprep.subr.bf16.mxu0 %v2479_v37 }
  0xa1   :  { %1379 = vmatpush3.bf16.msra.mxu1 %v2037_v4 }
  0xa2   :  { %1339 = vmatpush3.bf16.msra.mxu0 %v2480_v61  ;;  %1381 = vmatprep.subr.bf16.mxu1 %v2039_v58 }
  0xa3   :  { %1341 = vmatprep.subr.bf16.mxu0 %v2481_v1 }
  0xa5   :  { %1383 = vmatpush3.bf16.msra.mxu1 %v2041_v31 }
  0xa6   :  { %1343 = vmatpush3.bf16.msra.mxu0 %v2482_v39  ;;  %1417 = vmatprep.subr.bf16.mxu1 %v1663_v3  ;;  %v2486_v3 = vpack.c.bf16 %v2019_v9, %v2011_v34  ;;  %v2487_v9 = vld [vmem:[#allocation10_spill] sm:$0xff] }
  0xa7   :  { %1345 = vmatprep.subr.bf16.mxu0 %v2483_v6 }
  0xa8   :  { %691 = vmatmul.mubr.f32.vlgmr.msra.gmra.mrb[4].mxu1 %v179_v19 }
  0xa9   :  { %698 = vmatprep.mubr.f32.mxu1 %v188_v49  ;;  %1419 = vmatpush3.bf16.msra.mxu1 %v1684_v10  ;;  %v2488_v10 = vld [vmem:[#allocation11_spill] sm:$0xff] }
  0xaa   :  { %1347 = vmatpush3.bf16.msra.mxu0 %v2484_v40  ;;  %1421 = vmatprep.subr.bf16.mxu1 %v1719_v44  ;;  %v2489_v44 = vld [vmem:[#allocation12_spill] sm:$0xff] }
  0xab   :  { %1349 = vmatprep.subr.bf16.mxu0 %v2485_v26 }
  0xac   :  { %702 = vmatmul.mubr.f32.gmra.mrb[6].mxu1 %v194_v48 }
  0xad   :  { %1423 = vmatpush3.bf16.msra.mxu1 %v1753_v60  ;;  %1024 = vmatprep.mubr.msk.f32.mxu1 %vm32_vm5, %v2466_v22  ;;  %v2492_v60 = vld [vmem:[#allocation15_spill] sm:$0xff] }
  0xae   :  { %1351 = vmatpush3.bf16.msra.mxu0 %v2486_v3  ;;  %1425 = vmatprep.subr.bf16.mxu1 %v1798_v8  ;;  %v2495_v8 = vld [vmem:[#allocation18_spill] sm:$0xff] }
  0xaf   :  { %1385 = vmatprep.subr.bf16.mxu0 %v2082_v29 }
  0xb1   :  { %574 = vmatmul.mubr.f32.vlgmr.msra.gmra.mrb[4].mxu0 %v2192_v47  ;;  %1427 = vmatpush3.bf16.msra.mxu1 %v1826_v53 }
  0xb2   :  { %580 = vmatprep.mubr.f32.mxu0 %v187_v63  ;;  %1387 = vmatpush3.bf16.msra.mxu0 %v2089_v45 }
  0xb3   :  { %1429 = vmatprep.subr.bf16.mxu1 %v2468_v30  ;;  %1389 = vmatprep.subr.bf16.mxu0 %v2095_v56 }
  0xb5   :  { %583 = vmatmul.mubr.f32.gmra.mrb[6].mxu0 %v193_v59  ;;  %1431 = vmatpush3.bf16.msra.mxu1 %v2470_v15 }
  0xb6   :  { %1391 = vmatpush3.bf16.msra.mxu0 %v2487_v9  ;;  %1020 = vmatprep.mubr.msk.f32.mxu0 %vm32_vm5, %v2466_v22 }
  0xb7   :  { %1433 = vmatprep.subr.bf16.mxu1 %v2472_v38  ;;  %1393 = vmatprep.subr.bf16.mxu0 %v2488_v10 }
  0xb9   :  { %1435 = vmatpush3.bf16.msra.mxu1 %v2474_v23 }
  0xba   :  { %1395 = vmatpush3.bf16.msra.mxu0 %v2489_v44  ;;  %1437 = vmatprep.subr.bf16.mxu1 %v2476_v33 }
  0xbb   :  { %1397 = vmatprep.subr.bf16.mxu0 %v2490_v52 }
  0xbd   :  { %1439 = vmatpush3.bf16.msra.mxu1 %v2017_v42 }
  0xbe   :  { %1399 = vmatpush3.bf16.msra.mxu0 %v2491_v24  ;;  %1441 = vmatprep.subr.bf16.mxu1 %v2032_v41 }
  0xbf   :  { %1401 = vmatprep.subr.bf16.mxu0 %v2492_v60 }
  0xc1   :  { %1443 = vmatpush3.bf16.msra.mxu1 %v2037_v4 }
  0xc2   :  { %1403 = vmatpush3.bf16.msra.mxu0 %v2493_v16  ;;  %1445 = vmatprep.subr.bf16.mxu1 %v2039_v58 }
  0xc3   :  { %1405 = vmatprep.subr.bf16.mxu0 %v2494_v0 }
  0xc5   :  { %1447 = vmatpush3.bf16.msra.mxu1 %v2041_v31 }
  0xc6   :  { %1407 = vmatpush3.bf16.msra.mxu0 %v2495_v8 }
  0xc7   :  { %1409 = vmatprep.subr.bf16.mxu0 %v2496_v28 }
  0xc8   :  { %1025 = vmatmul.mubr.msk.f32.vlgmr.msra.gmra.mrb[8].mxu1 %vm31_vm4, %v2466_v22 }
  0xc9   :  { %1026 = vmatprep.mubr.msk.f32.mxu1 %vm34_vm7, %v2466_v22 }
  0xca   :  { %1411 = vmatpush3.bf16.msra.mxu0 %v2499_v50 }
  0xcb   :  { %1413 = vmatprep.subr.bf16.mxu0 %v2500_v57 }
  0xcc   :  { %1027 = vmatmul.mubr.msk.f32.gmra.mrb[10].mxu1 %vm33_vm6, %v2466_v22 }
  0xce   :  { %1415 = vmatpush3.bf16.msra.mxu0 %v2501_v18 }
  0xd1   :  { %1021 = vmatmul.mubr.msk.f32.vlgmr.msra.gmra.mrb[8].mxu0 %vm31_vm4, %v2466_v22 }
  0xd2   :  { %1022 = vmatprep.mubr.msk.f32.mxu0 %vm34_vm7, %v2466_v22 }
  0xd5   :  { %1023 = vmatmul.mubr.msk.f32.gmra.mrb[10].mxu0 %vm33_vm6, %v2466_v22 }
 0x15b   :  { %v1098_v62 = vpop.f32.mrb[0].mxu1 }
 0x15c   :  { %v1099_v7 = vpop.f32.mrb[1].mxu1 }
 0x15d   :  { %v1100_v55 = vadd.f32 %v1099_v7, %v1098_v62 }
 0x15f   :  { %v1101_v54 = vpop.f32.mrb[2].mxu1 }
 0x160   :  { %v1102_v27 = vpop.f32.mrb[3].mxu1 }
 0x161   :  { %v1103_v25 = vadd.f32 %v1102_v27, %v1101_v54 }
 0x164   :  { %v1060_v2 = vpop.f32.mrb[0].mxu0 }
 0x165   :  { %v1061_v59 = vpop.f32.mrb[1].mxu0 }
 0x166   :  { %v1062_v58 = vadd.f32 %v1061_v59, %v1060_v2 }
 0x168   :  { %v431_v34 = vadd.f32 %v1100_v55, %v1062_v58  ;;  %v1063_v42 = vpop.f32.mrb[2].mxu0 }
 0x169   :  { %v1064_v41 = vpop.f32.mrb[3].mxu0 }
 0x16a   :  { %v1065_v4 = vadd.f32 %v1064_v41, %v1063_v42 }
 0x16c   :  { %v438_v31 = vadd.f32 %v1103_v25, %v1065_v4 }
 0x17b   :  { %v1174_v30 = vpop.f32.mrb[4].mxu1 }
 0x17c   :  { %v1175_v63 = vpop.f32.mrb[5].mxu1 }
 0x17d   :  { %v1176_v49 = vadd.f32 %v1175_v63, %v1174_v30 }
 0x17f   :  { %v1177_v48 = vpop.f32.mrb[6].mxu1 }
 0x180   :  { %v1178_v29 = vpop.f32.mrb[7].mxu1 }
 0x181   :  { %v1179_v22 = vadd.f32 %v1178_v29, %v1177_v48 }
 0x184   :  { %v1136_v45 = vpop.f32.mrb[4].mxu0 }
 0x185   :  { %v1137_v56 = vpop.f32.mrb[5].mxu0 }
 0x186   :  { %v1138_v46 = vadd.f32 %v1137_v56, %v1136_v45 }
 0x188   :  { %v576_v51 = vadd.f32 %v1138_v46, %v431_v34  ;;  %v1139_v5 = vpop.f32.mrb[6].mxu0 }
 0x189   :  { %v1140_v47 = vpop.f32.mrb[7].mxu0 }
 0x18a   :  { %v1141_v20 = vadd.f32 %v1140_v47, %v1139_v5  ;;  %v693_v19 = vadd.f32 %v1176_v49, %v576_v51 }
 0x18c   :  { %v585_v43 = vadd.f32 %v1141_v20, %v438_v31 }
 0x18e   :  { %v704_v14 = vadd.f32 %v1179_v22, %v585_v43 }
 0x19b   :  { %v1250_v17 = vpop.f32.mrb[8].mxu1 }
 0x19c   :  { %v1251_v35 = vpop.f32.mrb[9].mxu1 }
 0x19d   :  { %v1252_v15 = vadd.f32 %v1251_v35, %v1250_v17 }
 0x19f   :  { %v1253_v11 = vpop.f32.mrb[10].mxu1 }
 0x1a0   :  { %v1254_v38 = vpop.f32.mrb[11].mxu1 }
 0x1a1   :  { %v1255_v21 = vadd.f32 %v1254_v38, %v1253_v11 }
 0x1a4   :  { %v1212_v23 = vpop.f32.mrb[8].mxu0 }
 0x1a5   :  { %v1213_v32 = vpop.f32.mrb[9].mxu0 }
 0x1a6   :  { %v1214_v33 = vadd.f32 %v1213_v32, %v1212_v23 }
 0x1a8   :  { %v872_v13 = vadd.f32 %v1214_v33, %v693_v19  ;;  %v1215_v36 = vpop.f32.mrb[10].mxu0 }
 0x1a9   :  { %v1216_v37 = vpop.f32.mrb[11].mxu0 }
 0x1aa   :  { %v983_v61 = vadd.f32 %v1252_v15, %v872_v13  ;;  %v1217_v1 = vadd.f32 %v1216_v37, %v1215_v36 }
 0x1ac   :  { %994 = vst.msk [vmem:[#allocation2] sm:$0xff] %vm993_vm8, %v983_v61  ;;  %v879_v39 = vadd.f32 %v1217_v1, %v704_v14 }
 0x1ae   :  { %v990_v6 = vadd.f32 %v1255_v21, %v879_v39 }
 0x1b0   :  { %995 = vst.msk [vmem:[#allocation2 + $0x8] sm:$0xff] %vm993_vm8, %v990_v6 }
 0x1b1   :  { %1466 = shalt.err (!%p1463_p4)
}
 0x1b2   :  { %s1467_s22 = scalar_lea.hbm %s2359_s2, 256 }
 0x1b3   :  { %p1468_p5 = scmp.ne.s32.totalorder %s2359_s2, %s1467_s22  ;;  %p1471_p6 = scmp.lt.u32.totalorder %s1467_s22, %s2359_s2 }
 0x1b5   :  { %p1473_p7 = pnand %p1471_p6, %p1468_p5 }
 0x1b7   :  { %1476 = shalt.err (!%p1473_p7)
}
 0x1b8   :  { %s1483_s27 = smov 128   ;;  %s1484_s28 = smov 8  }
 0x1b9   :  { %1007 = dma.vmem_to_hbm [thread:$0]  %s1002_s0, 256, %s2359_s2, [#allocation3], %s1483_s27, %s1483_s27, %s1484_s28  }
 0x1ba   :  { %1477 = dma.done.wait [#allocation3], 256  }
 0x1bb   :  { %1478 = vsyncadd [#allocation3], 4294967040 }
 0x1bc   :  { %1011 = vsyncpa [#allocation3], 1 }

// kernel: tpu_custom_call.1
= control target key start
LH: loop header
LB: loop body
LE: loop exit
PB: predicated region body
PF: predicated region fallthrough
CT: control target
= control target key end

     0   :  { %v1479_v3 = vmov 0   ;;  %s2357_s0 = inlined_call_operand.vmem [shape: s32[16,1], index: 0, kind: input, shape index: {}]   ;;  %s2358_s1 = inlined_call_operand.vmem [shape: f32[256,32], index: 1, kind: input, shape index: {}]   ;;  %s2359_s2 = inlined_call_operand.hbm [shape: f32[16,32], index: 2, kind: output, shape index: {}]  }
   0x1   :  { %v12_v0 = vld [vmem:[%s2357_s0] sm:$0xff]  ;;  %v13_v1 = vld [vmem:[%s2357_s0 + $0x8] sm:$0xff]  ;;  %1454 = vset.pattern.permute.xlu0 %v1479_v3  ;;  %v1532_v12 = vld [vmem:[%s2358_s1 + $0x90] sm:$0xff] }
   0x2   :  { %v1509_v2 = vld [vmem:[%s2358_s1 + $0x80] sm:$0xff]  ;;  %vm14_vm0 = vcmp.gt.s32.totalorder %v12_v0, 0  ;;  %vm16_vm1 = vcmp.gt.s32.totalorder %v13_v1, 0  ;;  %v1514_v4 = vld [vmem:[%s2358_s1 + $0x88] sm:$0xff]  ;;  %v1537_v13 = vld [vmem:[%s2358_s1 + $0x98] sm:$0xff]  ;;  %v130_v24 = vand.u32 4294901760, %v1532_v12 }
   0x3   :  { %v124_v5 = vand.u32 4294901760, %v1509_v2  ;;  %v1520_v6 = vld [vmem:[%s2358_s1] sm:$0xff]  ;;  %v1525_v7 = vld [vmem:[%s2358_s1 + $0x8] sm:$0xff]  ;;  %v15_v8 = vsel %vm14_vm0, %v12_v0, 0  ;;  %v17_v9 = vsel %vm16_vm1, %v13_v1, 0  ;;  %v127_v10 = vand.u32 4294901760, %v1514_v4 }
   0x4   :  { %v76_v11 = vand.u32 4294901760, %v1520_v6  ;;  %vm18_vm2 = vcmp.lt.s32.totalorder %v15_v8, 255  ;;  %vm20_vm3 = vcmp.lt.s32.totalorder %v17_v9, 255  ;;  %v79_v15 = vand.u32 4294901760, %v1525_v7  ;;  %v1548_v16 = vld [vmem:[%s2358_s1 + $0x10] sm:$0xff]  ;;  %v1553_v17 = vld [vmem:[%s2358_s1 + $0x18] sm:$0xff] }
   0x5   :  { %v1542_v14 = vsub.f32 %v1509_v2, %v124_v5  ;;  %v19_v18 = vsel %vm18_vm2, %v15_v8, 255  ;;  %v21_v19 = vsel %vm20_vm3, %v17_v9, 255  ;;  %v1556_v20 = vsub.f32 %v1514_v4, %v127_v10  ;;  %v1608_v38 = vld [vmem:[%s2358_s1 + $0xa0] sm:$0xff]  ;;  %v1618_v43 = vld [vmem:[%s2358_s1 + $0xa8] sm:$0xff] }
   0x6   :  { %v1561_v21 = vsub.f32 %v1520_v6, %v76_v11  ;;  %26 = vperm.xlu0 %1454, %v19_v18   ;;  %v1567_v23 = vsub.f32 %v1525_v7, %v79_v15  ;;  %v133_v25 = vand.u32 4294901760, %v1537_v13  ;;  %v82_v28 = vand.u32 4294901760, %v1548_v16  ;;  %v1639_v56 = vld [vmem:[%s2358_s1 + $0x20] sm:$0xff]  ;;  %v1644_v57 = vld [vmem:[%s2358_s1 + $0x28] sm:$0xff] }
   0x7   :  { %v2381_v22 = vand.u32 4294901760, %v1542_v14  ;;  %v2378_v26 = vand.u32 4294901760, %v1556_v20  ;;  %v85_v29 = vand.u32 4294901760, %v1553_v17  ;;  %v1582_v32 = vsub.f32 %v1532_v12, %v130_v24 }
   0x8   :  { %v2377_v27 = vand.u32 4294901760, %v1561_v21  ;;  %v2375_v31 = vand.u32 4294901760, %v1567_v23  ;;  %v1587_v33 = vsub.f32 %v1537_v13, %v133_v25  ;;  %v1598_v36 = vsub.f32 %v1548_v16, %v82_v28 }
   0x9   :  { %v318_v30 = vsub.f32 %v1542_v14, %v2381_v22  ;;  %v325_v34 = vsub.f32 %v1556_v20, %v2378_v26  ;;  %v1603_v37 = vsub.f32 %v1553_v17, %v85_v29  ;;  %v2374_v41 = vand.u32 4294901760, %v1582_v32 }
   0xa   :  { %v206_v35 = vsub.f32 %v1561_v21, %v2377_v27  ;;  %29 = vperm.xlu0 %1454, %v21_v19   ;;  %v213_v40 = vsub.f32 %v1567_v23, %v2375_v31  ;;  %v2372_v42 = vand.u32 4294901760, %v1587_v33  ;;  %v2371_v46 = vand.u32 4294901760, %v1598_v36 }
   0xb   :  { %v319_v39 = vand.u32 4294901760, %v318_v30  ;;  %v326_v44 = vand.u32 4294901760, %v325_v34  ;;  %v2370_v47 = vand.u32 4294901760, %v1603_v37  ;;  %v332_v49 = vsub.f32 %v1582_v32, %v2374_v41 }
   0xc   :  { %v207_v45 = vand.u32 4294901760, %v206_v35  ;;  %v214_v48 = vand.u32 4294901760, %v213_v40  ;;  %v339_v50 = vsub.f32 %v1587_v33, %v2372_v42  ;;  %v136_v51 = vand.u32 4294901760, %v1608_v38 }
   0xd   :  { %v1288_v52 = vpack.c.bf16 %v326_v44, %v319_v39  ;;  %v220_v53 = vsub.f32 %v1598_v36, %v2371_v46  ;;  %v227_v54 = vsub.f32 %v1603_v37, %v2370_v47  ;;  %v139_v55 = vand.u32 4294901760, %v1618_v43 }
   0xe   :  { %7 = vsyncpa [#allocation3], 0  ;;  %v1290_v58 = vpack.c.bf16 %v214_v48, %v207_v45  ;;  %v333_v59 = vand.u32 4294901760, %v332_v49  ;;  %v340_v60 = vand.u32 4294901760, %v339_v50  ;;  %v1649_v61 = vsub.f32 %v1608_v38, %v136_v51  ;;  %v1654_v62 = vld [vmem:[%s2358_s1 + $0xb0] sm:$0xff]  ;;  %v1668_v4 = vld [vmem:[%s2358_s1 + $0xb8] sm:$0xff] }
   0xf   :  { %1289 = vmatprep.subr.bf16.mxu1 %v1288_v52  ;;  %v221_v63 = vand.u32 4294901760, %v220_v53  ;;  %v228_v0 = vand.u32 4294901760, %v227_v54  ;;  %v1659_v1 = vsub.f32 %v1618_v43, %v139_v55  ;;  %v1663_v3 = vpack.c.bf16 %v127_v10, %v124_v5  ;;  %v1676_v30 = vld [vmem:[%s2358_s1 + $0x30] sm:$0xff]  ;;  %v1817_v43 = vld [vmem:[%s2358_s1 + $0xd8] sm:$0xff]  ;;  %v1886_v46 = vld [vmem:[%s2358_s1 + $0xe0] sm:$0xff] }
  0x10   :  { %1291 = vmatpush3.bf16.msra.mxu1 %v1290_v58  ;;  %v1292_v8 = vpack.c.bf16 %v340_v60, %v333_v59  ;;  %v2368_v9 = vand.u32 4294901760, %v1649_v61  ;;  %v88_v18 = vand.u32 4294901760, %v1639_v56  ;;  %v91_v19 = vand.u32 4294901760, %v1644_v57  ;;  %v1906_v41 = vld [vmem:[%s2358_s1 + $0xe8] sm:$0xff] }
  0x11   :  { %v1294_v2 = vpack.c.bf16 %v228_v0, %v221_v63  ;;  %v2366_v5 = vand.u32 4294901760, %v1659_v1  ;;  %1257 = vmatprep.subr.bf16.mxu0 %v1663_v3  ;;  %v1684_v10 = vpack.c.bf16 %v79_v15, %v76_v11  ;;  %v142_v34 = vand.u32 4294901760, %v1654_v62  ;;  %v1704_v11 = vld [vmem:[%s2358_s1 + $0x38] sm:$0xff]  ;;  %v1758_v63 = vld [vmem:[%s2358_s1 + $0xc8] sm:$0xff] }
  0x12   :  { %1293 = vmatprep.subr.bf16.mxu1 %v1292_v8  ;;  %v346_v35 = vsub.f32 %v1649_v61, %v2368_v9  ;;  %v1693_v39 = vsub.f32 %v1639_v56, %v88_v18  ;;  %v1698_v6 = vsub.f32 %v1644_v57, %v91_v19  ;;  %v145_v7 = vand.u32 4294901760, %v1668_v4 }
  0x13   :  { %v353_v15 = vsub.f32 %v1659_v1, %v2366_v5  ;;  %1259 = vmatpush3.bf16.msra.mxu0 %v1684_v10  ;;  %v1713_v40 = vsub.f32 %v1654_v62, %v142_v34  ;;  %v1719_v44 = vpack.c.bf16 %v133_v25, %v130_v24  ;;  %v94_v45 = vand.u32 4294901760, %v1676_v30  ;;  %v1740_v25 = vld [vmem:[%s2358_s1 + $0xc0] sm:$0xff] }
  0x14   :  { %1295 = vmatpush3.bf16.msra.mxu1 %v1294_v2  ;;  %v347_v48 = vand.u32 4294901760, %v346_v35  ;;  %v2364_v49 = vand.u32 4294901760, %v1693_v39  ;;  %v2362_v50 = vand.u32 4294901760, %v1698_v6  ;;  %v1727_v52 = vsub.f32 %v1668_v4, %v145_v7 }
  0x15   :  { %v354_v53 = vand.u32 4294901760, %v353_v15  ;;  %v2361_v12 = vand.u32 4294901760, %v1713_v40  ;;  %1261 = vmatprep.subr.bf16.mxu0 %v1719_v44  ;;  %v97_v13 = vand.u32 4294901760, %v1704_v11  ;;  %v1735_v24 = vsub.f32 %v1676_v30, %v94_v45  ;;  %v1777_v15 = vld [vmem:[%s2358_s1 + $0x40] sm:$0xff] }
  0x16   :  { %v234_v54 = vsub.f32 %v1693_v39, %v2364_v49  ;;  %v241_v58 = vsub.f32 %v1698_v6, %v2362_v50  ;;  %v2360_v59 = vand.u32 4294901760, %v1727_v52  ;;  %v1753_v60 = vpack.c.bf16 %v85_v29, %v82_v28 }
  0x17   :  { %v1296_v0 = vpack.c.bf16 %v354_v53, %v347_v48  ;;  %v360_v8 = vsub.f32 %v1713_v40, %v2361_v12  ;;  %v2363_v2 = vand.u32 4294901760, %v1735_v24  ;;  %v1767_v16 = vsub.f32 %v1704_v11, %v97_v13 }
  0x18   :  { %v235_v17 = vand.u32 4294901760, %v234_v54  ;;  %v242_v28 = vand.u32 4294901760, %v241_v58  ;;  %v367_v29 = vsub.f32 %v1727_v52, %v2360_v59  ;;  %1263 = vmatpush3.bf16.msra.mxu0 %v1753_v60  ;;  %v148_v35 = vand.u32 4294901760, %v1740_v25  ;;  %v1787_v59 = vld [vmem:[%s2358_s1 + $0x48] sm:$0xff] }
  0x19   :  { %1297 = vmatprep.subr.bf16.mxu1 %v1296_v0  ;;  %v361_v48 = vand.u32 4294901760, %v360_v8  ;;  %v248_v53 = vsub.f32 %v1735_v24, %v2363_v2  ;;  %v2365_v54 = vand.u32 4294901760, %v1767_v16  ;;  %v151_v58 = vand.u32 4294901760, %v1758_v63  ;;  %v1803_v2 = vld [vmem:[%s2358_s1 + $0xd0] sm:$0xff] }
  0x1a   :  { %v1298_v12 = vpack.c.bf16 %v242_v28, %v235_v17  ;;  %v368_v50 = vand.u32 4294901760, %v367_v29  ;;  %v1792_v0 = vsub.f32 %v1740_v25, %v148_v35  ;;  %v1798_v8 = vpack.c.bf16 %v139_v55, %v136_v51 }
  0x1b   :  { %v249_v49 = vand.u32 4294901760, %v248_v53  ;;  %v255_v17 = vsub.f32 %v1767_v16, %v2365_v54  ;;  %v1811_v28 = vsub.f32 %v1758_v63, %v151_v58  ;;  %v100_v38 = vand.u32 4294901760, %v1777_v15 }
  0x1c   :  { %1299 = vmatpush3.bf16.msra.mxu1 %v1298_v12  ;;  %v1300_v51 = vpack.c.bf16 %v368_v50, %v361_v48  ;;  %v2367_v55 = vand.u32 4294901760, %v1792_v0  ;;  %1265 = vmatprep.subr.bf16.mxu0 %v1798_v8  ;;  %v103_v29 = vand.u32 4294901760, %v1787_v59  ;;  %v1826_v53 = vpack.c.bf16 %v91_v19, %v88_v18  ;;  %v1838_v48 = vld [vmem:[%s2358_s1 + $0x50] sm:$0xff] }
  0x1d   :  { %v256_v54 = vand.u32 4294901760, %v255_v17  ;;  %v2369_v5 = vand.u32 4294901760, %v1811_v28  ;;  %v1832_v12 = vsub.f32 %v1777_v15, %v100_v38  ;;  %v2388_v50 = vand.u32 4294901760, %v1803_v2  ;;  %v1859_v17 = vld [vmem:[%s2358_s1 + $0x58] sm:$0xff] }
  0x1e   :  { %1301 = vmatprep.subr.bf16.mxu1 %v1300_v51  ;;  %v374_v56 = vsub.f32 %v1792_v0, %v2367_v55  ;;  %v1846_v57 = vsub.f32 %v1787_v59, %v103_v29  ;;  %1267 = vmatpush3.bf16.msra.mxu0 %v1826_v53  ;;  %v2387_v18 = vand.u32 4294901760, %v1817_v43  ;;  %v1854_v19 = vpack.c.bf16 %v145_v7, %v142_v34 }
  0x1f   :  { %v1302_v51 = vpack.c.bf16 %v256_v54, %v249_v49  ;;  %v381_v55 = vsub.f32 %v1811_v28, %v2369_v5  ;;  %v2373_v9 = vand.u32 4294901760, %v1832_v12  ;;  %v1868_v62 = vsub.f32 %v1803_v2, %v2388_v50 }
  0x20   :  { %2411 = vst [vmem:[#allocation5_spill] sm:$0xff] %v1854_v19  ;;  %v375_v4 = vand.u32 4294901760, %v374_v56  ;;  %v2376_v34 = vand.u32 4294901760, %v1846_v57  ;;  %v1874_v7 = vsub.f32 %v1817_v43, %v2387_v18  ;;  %1269 = vmatprep.subr.bf16.mxu0 %v1854_v19  ;;  %v2383_v49 = vand.u32 4294901760, %v1838_v48 }
  0x21   :  { %1303 = vmatpush3.bf16.msra.mxu1 %v1302_v51  ;;  %v382_v54 = vand.u32 4294901760, %v381_v55  ;;  %v262_v5 = vsub.f32 %v1832_v12, %v2373_v9  ;;  %v2380_v47 = vand.u32 4294901760, %v1868_v62  ;;  %v2382_v56 = vand.u32 4294901760, %v1859_v17 }
  0x22   :  { %v269_v42 = vsub.f32 %v1846_v57, %v2376_v34  ;;  %v2379_v51 = vand.u32 4294901760, %v1874_v7  ;;  %v1895_v55 = vsub.f32 %v1838_v48, %v2383_v49  ;;  %v1901_v9 = vpack.c.bf16 %v97_v13, %v94_v45  ;;  %v1925_v13 = vld [vmem:[%s2358_s1 + $0x60] sm:$0xff] }
  0x23   :  { %v1304_v31 = vpack.c.bf16 %v382_v54, %v375_v4  ;;  %v263_v34 = vand.u32 4294901760, %v262_v5  ;;  %v388_v27 = vsub.f32 %v1868_v62, %v2380_v47  ;;  %v1914_v26 = vsub.f32 %v1859_v17, %v2382_v56  ;;  %v1930_v4 = vld [vmem:[%s2358_s1 + $0x68] sm:$0xff] }
  0x24   :  { %2412 = vst [vmem:[#allocation6_spill] sm:$0xff] %v1901_v9  ;;  %v270_v30 = vand.u32 4294901760, %v269_v42  ;;  %v395_v11 = vsub.f32 %v1874_v7, %v2379_v51  ;;  %v2385_v45 = vand.u32 4294901760, %v1895_v55  ;;  %1271 = vmatpush3.bf16.msra.mxu0 %v1901_v9  ;;  %v2386_v5 = vand.u32 4294901760, %v1886_v46 }
  0x25   :  { %1305 = vmatprep.subr.bf16.mxu1 %v1304_v31  ;;  %v389_v42 = vand.u32 4294901760, %v388_v27  ;;  %v2384_v54 = vand.u32 4294901760, %v1914_v26  ;;  %v163_v51 = vand.u32 4294901760, %v1906_v41  ;;  %v1938_v47 = vpack.c.bf16 %v151_v58, %v148_v35  ;;  %v73_v58 = vld [vmem:[%s2358_s1 + $0xf0] sm:$0xff] }
  0x26   :  { %v1306_v22 = vpack.c.bf16 %v270_v30, %v263_v34  ;;  %v396_v56 = vand.u32 4294901760, %v395_v11  ;;  %v276_v49 = vsub.f32 %v1895_v55, %v2385_v45  ;;  %v1946_v27 = vsub.f32 %v1886_v46, %v2386_v5  ;;  %v74_v34 = vld [vmem:[%s2358_s1 + $0xf8] sm:$0xff] }
  0x27   :  { %2413 = vst [vmem:[#allocation7_spill] sm:$0xff] %v1938_v47  ;;  %v283_v31 = vsub.f32 %v1914_v26, %v2384_v54  ;;  %v1952_v25 = vsub.f32 %v1906_v41, %v163_v51  ;;  %1273 = vmatprep.subr.bf16.mxu0 %v1938_v47  ;;  %v112_v63 = vand.u32 4294901760, %v1925_v13  ;;  %v115_v35 = vand.u32 4294901760, %v1930_v4 }
  0x28   :  { %1307 = vmatpush3.bf16.msra.mxu1 %v1306_v22  ;;  %v1308_v30 = vpack.c.bf16 %v396_v56, %v389_v42  ;;  %v277_v11 = vand.u32 4294901760, %v276_v49  ;;  %v2389_v41 = vand.u32 4294901760, %v1946_v27  ;;  %v1968_v54 = vpack.c.bf16 %v103_v29, %v100_v38  ;;  %v57_v22 = vld [vmem:[%s2358_s1 + $0x70] sm:$0xff] }
  0x29   :  { %v284_v45 = vand.u32 4294901760, %v283_v31  ;;  %v2392_v5 = vand.u32 4294901760, %v1952_v25  ;;  %v1972_v18 = vsub.f32 %v1925_v13, %v112_v63  ;;  %v1975_v50 = vsub.f32 %v1930_v4, %v115_v35  ;;  %v58_v13 = vld [vmem:[%s2358_s1 + $0x78] sm:$0xff]  ;;  %s1482_s1 = smov [#allocation2]  }
  0x2a   :  { %2414 = vst [vmem:[#allocation8_spill] sm:$0xff] %v1968_v54  ;;  %1309 = vmatprep.subr.bf16.mxu1 %v1308_v30  ;;  %v402_v59 = vsub.f32 %v1946_v27, %v2389_v41  ;;  %1275 = vmatpush3.bf16.msra.mxu0 %v1968_v54  ;;  %v166_v15 = vand.u32 4294901760, %v73_v58  ;;  %v169_v38 = vand.u32 4294901760, %v74_v34  ;;  %v2415_v29 = vand.u32 4294901760, %v1803_v2  ;;  %s1001_s0 = sshll.u32 %s1482_s1, 4  ;;  %s1002_s0 = int_to_ptr.vmem [resolvable:$true] %s1001_s0 }
  0x2b   :  { %v2416_v49 = vand.u32 4294901760, %v1817_v43  ;;  %v1310_v4 = vpack.c.bf16 %v284_v45, %v277_v11  ;;  %v409_v42 = vsub.f32 %v1952_v25, %v2392_v5  ;;  %v2397_v31 = vand.u32 4294901760, %v1972_v18  ;;  %s1455_s19 = scalar_lea.vmem %s1002_s0, 256  ;;  %p1460_p1 = scmp.lt.s32.totalorder %s1002_s0, %s1002_s0 }
  0x2c   :  { %v2400_v30 = vand.u32 4294901760, %v1975_v50  ;;  %v403_v41 = vand.u32 4294901760, %v402_v59  ;;  %v1998_v54 = vsub.f32 %v73_v58, %v166_v15  ;;  %v2000_v2 = vsub.f32 %v74_v34, %v169_v38  ;;  %p1456_p0 = scmp.ne.s32.totalorder %s1002_s0, %s1455_s19  ;;  %p1461_p2 = scmp.lt.s32.totalorder %s1455_s19, %s1455_s19 }
  0x2d   :  { %v1988_v56 = vpack.c.bf16 %v2416_v49, %v2415_v29  ;;  %v118_v43 = vand.u32 4294901760, %v57_v22  ;;  %1311 = vmatpush3.bf16.msra.mxu1 %v1310_v4  ;;  %v410_v29 = vand.u32 4294901760, %v409_v42  ;;  %v290_v45 = vsub.f32 %v1972_v18, %v2397_v31 }
  0x2e   :  { %v297_v11 = vsub.f32 %v1975_v50, %v2400_v30  ;;  %v121_v49 = vand.u32 4294901760, %v58_v13  ;;  %v2404_v59 = vand.u32 4294901760, %v1998_v54  ;;  %v2403_v58 = vand.u32 4294901760, %v2000_v2  ;;  %p1462_p3 = por %p1461_p2, %p1460_p1 }
  0x2f   :  { %2417 = vst [vmem:[#allocation9_spill] sm:$0xff] %v1988_v56  ;;  %1277 = vmatprep.subr.bf16.mxu0 %v1988_v56  ;;  %v2011_v34 = vsub.f32 %v57_v22, %v118_v43  ;;  %v2418_v5 = vand.u32 4294901760, %v1838_v48  ;;  %v2419_v4 = vand.u32 4294901760, %v1859_v17  ;;  %v1312_v56 = vpack.c.bf16 %v410_v29, %v403_v41 }
  0x30   :  { %v291_v47 = vand.u32 4294901760, %v290_v45  ;;  %v298_v31 = vand.u32 4294901760, %v297_v11  ;;  %v2019_v9 = vsub.f32 %v58_v13, %v121_v49  ;;  %v416_v30 = vsub.f32 %v1998_v54, %v2404_v59  ;;  %p1463_p4 = pnand %p1462_p3, %p1456_p0 }
  0x31   :  { %v2017_v42 = vpack.c.bf16 %v2419_v4, %v2418_v5  ;;  %v423_v22 = vsub.f32 %v2000_v2, %v2403_v58  ;;  %v303_v19 = vand.u32 4294901760, %v2011_v34  ;;  %1313 = vmatprep.subr.bf16.mxu1 %v1312_v56  ;;  %v2420_v5 = vand.u32 4294901760, %v1886_v46 }
  0x32   :  { %v1314_v48 = vpack.c.bf16 %v298_v31, %v291_v47  ;;  %v310_v17 = vand.u32 4294901760, %v2019_v9  ;;  %v417_v13 = vand.u32 4294901760, %v416_v30  ;;  %v2037_v4 = vpack.c.bf16 %v115_v35, %v112_v63 }
  0x33   :  { %1279 = vmatpush3.bf16.msra.mxu0 %v2017_v42  ;;  %v2032_v41 = vpack.c.bf16 %v163_v51, %v2420_v5  ;;  %v424_v29 = vand.u32 4294901760, %v423_v22  ;;  %v304_v45 = vsub.f32 %v2011_v34, %v303_v19  ;;  %v2039_v58 = vpack.c.bf16 %v169_v38, %v166_v15 }
  0x34   :  { %1315 = vmatpush3.bf16.msra.mxu1 %v1314_v48  ;;  %v311_v11 = vsub.f32 %v2019_v9, %v310_v17  ;;  %v2041_v31 = vpack.c.bf16 %v121_v49, %v118_v43  ;;  %v1320_v46 = vpack.c.bf16 %v1556_v20, %v1542_v14  ;;  %v2426_v5 = vand.u32 4294901760, %v1587_v33 }
  0x35   :  { %1281 = vmatprep.subr.bf16.mxu0 %v2032_v41  ;;  %v1316_v47 = vpack.c.bf16 %v424_v29, %v417_v13  ;;  %v305_v56 = vand.u32 4294901760, %v304_v45  ;;  %v2422_v13 = vand.u32 4294901760, %v1556_v20  ;;  %v2428_v20 = vand.u32 4294901760, %v1603_v37 }
  0x36   :  { %v312_v51 = vand.u32 4294901760, %v311_v11  ;;  %v2423_v11 = vand.u32 4294901760, %v1561_v21  ;;  %vm993_vm8 = vcmask 261120  }
  0x37   :  { %1283 = vmatpush3.bf16.msra.mxu0 %v2037_v4  ;;  %1317 = vmatprep.subr.bf16.mxu1 %v1316_v47  ;;  %v2425_v47 = vand.u32 4294901760, %v1582_v32 }
  0x38   :  { %1285 = vmatprep.subr.bf16.mxu0 %v2039_v58  ;;  %v1318_v43 = vpack.c.bf16 %v312_v51, %v305_v56  ;;  %v2421_v51 = vand.u32 4294901760, %v1542_v14  ;;  %v2427_v14 = vand.u32 4294901760, %v1598_v36 }
  0x39   :  { %v2095_v56 = vpack.c.bf16 %v2426_v5, %v2425_v47  ;;  %v2436_v5 = vand.u32 4294901760, %v1713_v40  ;;  %v2437_v47 = vand.u32 4294901760, %v1727_v52 }
  0x3a   :  { %1319 = vmatpush3.bf16.msra.mxu1 %v1318_v43  ;;  %v2082_v29 = vpack.c.bf16 %v2422_v13, %v2421_v51  ;;  %v2424_v43 = vand.u32 4294901760, %v1567_v23  ;;  %v2101_v13 = vpack.c.bf16 %v2428_v20, %v2427_v14  ;;  %v2431_v51 = vand.u32 4294901760, %v1659_v1 }
  0x3b   :  { %1287 = vmatpush3.bf16.msra.mxu0 %v2041_v31  ;;  %1353 = vmatprep.subr.bf16.mxu1 %v1663_v3  ;;  %v2119_v38 = vpack.c.bf16 %v2437_v47, %v2436_v5  ;;  %v2439_v14 = vand.u32 4294901760, %v1735_v24  ;;  %v2440_v20 = vand.u32 4294901760, %v1767_v16  ;;  %v2448_v5 = vand.u32 4294901760, %v1868_v62 }
  0x3c   :  { %1321 = vmatprep.subr.bf16.mxu0 %v1320_v46  ;;  %v2089_v45 = vpack.c.bf16 %v2424_v43, %v2423_v11  ;;  %2429 = vst [vmem:[#allocation10_spill] sm:$0xff] %v2101_v13  ;;  %v2430_v46 = vand.u32 4294901760, %v1649_v61  ;;  %v2433_v11 = vand.u32 4294901760, %v1693_v39  ;;  %v2434_v43 = vand.u32 4294901760, %v1698_v6 }
  0x3d   :  { %2438 = vst [vmem:[#allocation13_spill] sm:$0xff] %v2119_v38  ;;  %v2125_v15 = vpack.c.bf16 %v2440_v20, %v2439_v14  ;;  %v2449_v47 = vand.u32 4294901760, %v1874_v7  ;;  %v2451_v14 = vand.u32 4294901760, %v1895_v55  ;;  %v2452_v20 = vand.u32 4294901760, %v1914_v26 }
  0x3e   :  { %v2107_v48 = vpack.c.bf16 %v2431_v51, %v2430_v46  ;;  %v2113_v49 = vpack.c.bf16 %v2434_v43, %v2433_v11  ;;  %v2442_v46 = vand.u32 4294901760, %v1792_v0  ;;  %v2443_v51 = vand.u32 4294901760, %v1811_v28 }
  0x3f   :  { %2441 = vst [vmem:[#allocation14_spill] sm:$0xff] %v2125_v15  ;;  %v2445_v11 = vand.u32 4294901760, %v1832_v12  ;;  %v2446_v43 = vand.u32 4294901760, %v1846_v57  ;;  %v2143_v22 = vpack.c.bf16 %v2449_v47, %v2448_v5  ;;  %v2149_v30 = vpack.c.bf16 %v2452_v20, %v2451_v14 }
  0x40   :  { %2432 = vst [vmem:[#allocation11_spill] sm:$0xff] %v2107_v48  ;;  %2435 = vst [vmem:[#allocation12_spill] sm:$0xff] %v2113_v49  ;;  %v2131_v35 = vpack.c.bf16 %v2443_v51, %v2442_v46  ;;  %v2454_v46 = vand.u32 4294901760, %v1946_v27  ;;  %v2455_v51 = vand.u32 4294901760, %v1952_v25  ;;  %v2460_v5 = vand.u32 4294901760, %v1998_v54 }
  0x41   :  { %v2137_v63 = vpack.c.bf16 %v2446_v43, %v2445_v11  ;;  %2450 = vst [vmem:[#allocation17_spill] sm:$0xff] %v2143_v22  ;;  %2453 = vst [vmem:[#allocation18_spill] sm:$0xff] %v2149_v30  ;;  %v2457_v11 = vand.u32 4294901760, %v1972_v18  ;;  %v2458_v43 = vand.u32 4294901760, %v1975_v50  ;;  %v2461_v47 = vand.u32 4294901760, %v2000_v2 }
  0x42   :  { %2444 = vst [vmem:[#allocation15_spill] sm:$0xff] %v2131_v35  ;;  %v2155_v59 = vpack.c.bf16 %v2455_v51, %v2454_v46  ;;  %v2169_v14 = vpack.c.bf16 %v310_v17, %v303_v19  ;;  %v22_v20 = vlaneseq }
  0x43   :  { %2447 = vst [vmem:[#allocation16_spill] sm:$0xff] %v2137_v63  ;;  %v2161_v63 = vpack.c.bf16 %v2458_v43, %v2457_v11  ;;  %v2167_v22 = vpack.c.bf16 %v2461_v47, %v2460_v5  ;;  %v1480_v11 = vmov 0.0   ;;  %v2405_v43 = vmov 1.0  }
  0x44   :  { %2456 = vst [vmem:[#allocation19_spill] sm:$0xff] %v2155_v59  ;;  %2463 = vst [vmem:[#allocation22_spill] sm:$0xff] %v2169_v14  ;;  %v2171_v30 = vand.u32 127, %v22_v20 }
  0x45   :  { %2459 = vst [vmem:[#allocation20_spill] sm:$0xff] %v2161_v63  ;;  %2462 = vst [vmem:[#allocation21_spill] sm:$0xff] %v2167_v22  ;;  %v2466_v22 = vmov 1.0  }
  0x46   :  { %2464 = vst [vmem:[#allocation23_spill] sm:$0xff] %v2171_v30  ;;  %v2174_v46 = vadd.s32 128, %v2171_v30 }
  0x85   :  { %v2176_v51 = vpop.permute.xlu0 %26 }
  0x86   :  { %vm31_vm4 = vcmp.eq.s32.totalorder %v2176_v51, %v2171_v30  ;;  %vm32_vm5 = vcmp.eq.s32.totalorder %v2176_v51, %v2174_v46 }
  0x87   :  { %v1012_v19 = vsel %vm31_vm4, 1.0, %v1480_v11  ;;  %v1013_v17 = vsel %vm32_vm5, 1.0, %v1480_v11  ;;  %1016 = vmatprep.mubr.msk.f32.mxu1 %vm32_vm5, %v2405_v43 }
  0x88   :  { %v172_v5 = vsub.f32 %v1013_v17, %v1013_v17  ;;  %v2192_v47 = vsub.f32 %v1012_v19, %v1012_v19  ;;  %1017 = vmatmul.mubr.msk.f32.vlgmr.msra.gmra.mrb[0].mxu1 %vm31_vm4, %v2405_v43 }
  0x89   :  { %1355 = vmatpush3.bf16.msra.mxu1 %v1684_v10  ;;  %v2199_v20 = vpop.permute.xlu0 %29 }
  0x8a   :  { %2465 = vst [vmem:[#allocation24_spill] sm:$0xff] %v2199_v20  ;;  %vm33_vm6 = vcmp.eq.s32.totalorder %v2199_v20, %v2171_v30  ;;  %vm34_vm7 = vcmp.eq.s32.totalorder %v2199_v20, %v2174_v46  ;;  %1357 = vmatprep.subr.bf16.mxu1 %v1719_v44  ;;  %v173_v17 = vand.u32 4294901760, %v172_v5  ;;  %v179_v19 = vand.u32 4294901760, %v2192_v47  ;;  %v2468_v30 = vld [vmem:[#allocation5_spill] sm:$0xff] }
  0x8b   :  { %v1014_v14 = vsel %vm33_vm6, 1.0, %v1480_v11  ;;  %v1015_v43 = vsel %vm34_vm7, 1.0, %v1480_v11  ;;  %1018 = vmatprep.mubr.msk.f32.mxu1 %vm34_vm7, %v2466_v22  ;;  %v2467_v20 = vpack.c.bf16 %v1567_v23, %v1561_v21  ;;  %v2473_v21 = vpack.c.bf16 %v1659_v1, %v1649_v61  ;;  %v2474_v23 = vld [vmem:[#allocation8_spill] sm:$0xff] }
  0x8c   :  { %v187_v63 = vsub.f32 %v1015_v43, %v1015_v43  ;;  %v193_v59 = vsub.f32 %v1014_v14, %v1014_v14  ;;  %1019 = vmatmul.mubr.msk.f32.gmra.mrb[2].mxu1 %vm33_vm6, %v2466_v22  ;;  %v174_v35 = vsub.f32 %v172_v5, %v173_v17  ;;  %v180_v15 = vsub.f32 %v2192_v47, %v179_v19 }
  0x8d   :  { %1359 = vmatpush3.bf16.msra.mxu1 %v1753_v60  ;;  %687 = vmatprep.mubr.f32.mxu1 %v173_v17  ;;  %v2480_v61 = vpack.c.bf16 %v1846_v57, %v1832_v12  ;;  %v2481_v1 = vpack.c.bf16 %v1874_v7, %v1868_v62  ;;  %v2500_v57 = vld [vmem:[#allocation21_spill] sm:$0xff] }
  0x8e   :  { %1361 = vmatprep.subr.bf16.mxu1 %v1798_v8  ;;  %v175_v11 = vand.u32 4294901760, %v174_v35  ;;  %v181_v38 = vand.u32 4294901760, %v180_v15  ;;  %v188_v49 = vand.u32 4294901760, %v187_v63  ;;  %v194_v48 = vand.u32 4294901760, %v193_v59  ;;  %v2470_v15 = vld [vmem:[#allocation6_spill] sm:$0xff] }
  0x8f   :  { %v2469_v35 = vpack.c.bf16 %v1587_v33, %v1582_v32  ;;  %v2475_v32 = vpack.c.bf16 %v1698_v6, %v1693_v39  ;;  %v2476_v33 = vld [vmem:[#allocation9_spill] sm:$0xff]  ;;  %v2482_v39 = vpack.c.bf16 %v1914_v26, %v1895_v55  ;;  %v2483_v6 = vpack.c.bf16 %v1952_v25, %v1946_v27 }
  0x90   :  { %176 = vmatprep.mubr.f32.mxu0 %v175_v11  ;;  %v189_v43 = vsub.f32 %v187_v63, %v188_v49  ;;  %v195_v14 = vsub.f32 %v193_v59, %v194_v48  ;;  %v2471_v11 = vpack.c.bf16 %v1603_v37, %v1598_v36  ;;  %v2478_v36 = vpack.c.bf16 %v1767_v16, %v1735_v24  ;;  %v2491_v24 = vld [vmem:[#allocation14_spill] sm:$0xff]  ;;  %v2493_v16 = vld [vmem:[#allocation16_spill] sm:$0xff] }
  0x91   :  { %1363 = vmatpush3.bf16.msra.mxu1 %v1826_v53  ;;  %182 = vmatmul.mubr.f32.vlgmr.msra.gmra.mrb[0].mxu0 %v181_v38  ;;  %v2472_v38 = vld [vmem:[#allocation7_spill] sm:$0xff]  ;;  %v2479_v37 = vpack.c.bf16 %v1811_v28, %v1792_v0  ;;  %v2485_v26 = vpack.c.bf16 %v2000_v2, %v1998_v54  ;;  %v2494_v0 = vld [vmem:[#allocation17_spill] sm:$0xff] }
  0x92   :  { %1323 = vmatpush3.bf16.msra.mxu0 %v2467_v20  ;;  %1365 = vmatprep.subr.bf16.mxu1 %v2468_v30  ;;  %v190_v13 = vand.u32 4294901760, %v189_v43  ;;  %v196_v17 = vand.u32 4294901760, %v195_v14  ;;  %v2496_v28 = vld [vmem:[#allocation19_spill] sm:$0xff] }
  0x93   :  { %1325 = vmatprep.subr.bf16.mxu0 %v2469_v35 }
  0x94   :  { %191 = vmatprep.mubr.f32.mxu0 %v190_v13  ;;  %v2477_v13 = vpack.c.bf16 %v1727_v52, %v1713_v40  ;;  %v2484_v40 = vpack.c.bf16 %v1975_v50, %v1972_v18  ;;  %v2490_v52 = vld [vmem:[#allocation13_spill] sm:$0xff]  ;;  %v2499_v50 = vld [vmem:[#allocation20_spill] sm:$0xff]  ;;  %v2501_v18 = vld [vmem:[#allocation22_spill] sm:$0xff] }
  0x95   :  { %1367 = vmatpush3.bf16.msra.mxu1 %v2470_v15  ;;  %197 = vmatmul.mubr.f32.gmra.mrb[2].mxu0 %v196_v17 }
  0x96   :  { %1327 = vmatpush3.bf16.msra.mxu0 %v2471_v11  ;;  %571 = vmatprep.mubr.f32.mxu0 %v172_v5 }
  0x97   :  { %1369 = vmatprep.subr.bf16.mxu1 %v2472_v38  ;;  %1329 = vmatprep.subr.bf16.mxu0 %v2473_v21 }
  0x99   :  { %1371 = vmatpush3.bf16.msra.mxu1 %v2474_v23 }
  0x9a   :  { %1331 = vmatpush3.bf16.msra.mxu0 %v2475_v32  ;;  %1373 = vmatprep.subr.bf16.mxu1 %v2476_v33 }
  0x9b   :  { %1333 = vmatprep.subr.bf16.mxu0 %v2477_v13 }
  0x9d   :  { %1375 = vmatpush3.bf16.msra.mxu1 %v2017_v42 }
  0x9e   :  { %1335 = vmatpush3.bf16.msra.mxu0 %v2478_v36  ;;  %1377 = vmatprep.subr.bf16.mxu1 %v2032_v41 }
  0x9f   :  { %1337 = vmatprep.subr.bf16.mxu0 %v2479_v37 }
  0xa1   :  { %1379 = vmatpush3.bf16.msra.mxu1 %v2037_v4 }
  0xa2   :  { %1339 = vmatpush3.bf16.msra.mxu0 %v2480_v61  ;;  %1381 = vmatprep.subr.bf16.mxu1 %v2039_v58 }
  0xa3   :  { %1341 = vmatprep.subr.bf16.mxu0 %v2481_v1 }
  0xa5   :  { %1383 = vmatpush3.bf16.msra.mxu1 %v2041_v31 }
  0xa6   :  { %1343 = vmatpush3.bf16.msra.mxu0 %v2482_v39  ;;  %1417 = vmatprep.subr.bf16.mxu1 %v1663_v3  ;;  %v2486_v3 = vpack.c.bf16 %v2019_v9, %v2011_v34  ;;  %v2487_v9 = vld [vmem:[#allocation10_spill] sm:$0xff] }
  0xa7   :  { %1345 = vmatprep.subr.bf16.mxu0 %v2483_v6 }
  0xa8   :  { %691 = vmatmul.mubr.f32.vlgmr.msra.gmra.mrb[4].mxu1 %v179_v19 }
  0xa9   :  { %698 = vmatprep.mubr.f32.mxu1 %v188_v49  ;;  %1419 = vmatpush3.bf16.msra.mxu1 %v1684_v10  ;;  %v2488_v10 = vld [vmem:[#allocation11_spill] sm:$0xff] }
  0xaa   :  { %1347 = vmatpush3.bf16.msra.mxu0 %v2484_v40  ;;  %1421 = vmatprep.subr.bf16.mxu1 %v1719_v44  ;;  %v2489_v44 = vld [vmem:[#allocation12_spill] sm:$0xff] }
  0xab   :  { %1349 = vmatprep.subr.bf16.mxu0 %v2485_v26 }
  0xac   :  { %702 = vmatmul.mubr.f32.gmra.mrb[6].mxu1 %v194_v48 }
  0xad   :  { %1423 = vmatpush3.bf16.msra.mxu1 %v1753_v60  ;;  %1024 = vmatprep.mubr.msk.f32.mxu1 %vm32_vm5, %v2466_v22  ;;  %v2492_v60 = vld [vmem:[#allocation15_spill] sm:$0xff] }
  0xae   :  { %1351 = vmatpush3.bf16.msra.mxu0 %v2486_v3  ;;  %1425 = vmatprep.subr.bf16.mxu1 %v1798_v8  ;;  %v2495_v8 = vld [vmem:[#allocation18_spill] sm:$0xff] }
  0xaf   :  { %1385 = vmatprep.subr.bf16.mxu0 %v2082_v29 }
  0xb1   :  { %574 = vmatmul.mubr.f32.vlgmr.msra.gmra.mrb[4].mxu0 %v2192_v47  ;;  %1427 = vmatpush3.bf16.msra.mxu1 %v1826_v53 }
  0xb2   :  { %580 = vmatprep.mubr.f32.mxu0 %v187_v63  ;;  %1387 = vmatpush3.bf16.msra.mxu0 %v2089_v45 }
  0xb3   :  { %1429 = vmatprep.subr.bf16.mxu1 %v2468_v30  ;;  %1389 = vmatprep.subr.bf16.mxu0 %v2095_v56 }
  0xb5   :  { %583 = vmatmul.mubr.f32.gmra.mrb[6].mxu0 %v193_v59  ;;  %1431 = vmatpush3.bf16.msra.mxu1 %v2470_v15 }
  0xb6   :  { %1391 = vmatpush3.bf16.msra.mxu0 %v2487_v9  ;;  %1020 = vmatprep.mubr.msk.f32.mxu0 %vm32_vm5, %v2466_v22 }
  0xb7   :  { %1433 = vmatprep.subr.bf16.mxu1 %v2472_v38  ;;  %1393 = vmatprep.subr.bf16.mxu0 %v2488_v10 }
  0xb9   :  { %1435 = vmatpush3.bf16.msra.mxu1 %v2474_v23 }
  0xba   :  { %1395 = vmatpush3.bf16.msra.mxu0 %v2489_v44  ;;  %1437 = vmatprep.subr.bf16.mxu1 %v2476_v33 }
  0xbb   :  { %1397 = vmatprep.subr.bf16.mxu0 %v2490_v52 }
  0xbd   :  { %1439 = vmatpush3.bf16.msra.mxu1 %v2017_v42 }
  0xbe   :  { %1399 = vmatpush3.bf16.msra.mxu0 %v2491_v24  ;;  %1441 = vmatprep.subr.bf16.mxu1 %v2032_v41 }
  0xbf   :  { %1401 = vmatprep.subr.bf16.mxu0 %v2492_v60 }
  0xc1   :  { %1443 = vmatpush3.bf16.msra.mxu1 %v2037_v4 }
  0xc2   :  { %1403 = vmatpush3.bf16.msra.mxu0 %v2493_v16  ;;  %1445 = vmatprep.subr.bf16.mxu1 %v2039_v58 }
  0xc3   :  { %1405 = vmatprep.subr.bf16.mxu0 %v2494_v0 }
  0xc5   :  { %1447 = vmatpush3.bf16.msra.mxu1 %v2041_v31 }
  0xc6   :  { %1407 = vmatpush3.bf16.msra.mxu0 %v2495_v8 }
  0xc7   :  { %1409 = vmatprep.subr.bf16.mxu0 %v2496_v28 }
  0xc8   :  { %1025 = vmatmul.mubr.msk.f32.vlgmr.msra.gmra.mrb[8].mxu1 %vm31_vm4, %v2466_v22 }
  0xc9   :  { %1026 = vmatprep.mubr.msk.f32.mxu1 %vm34_vm7, %v2466_v22 }
  0xca   :  { %1411 = vmatpush3.bf16.msra.mxu0 %v2499_v50 }
  0xcb   :  { %1413 = vmatprep.subr.bf16.mxu0 %v2500_v57 }
  0xcc   :  { %1027 = vmatmul.mubr.msk.f32.gmra.mrb[10].mxu1 %vm33_vm6, %v2466_v22 }
  0xce   :  { %1415 = vmatpush3.bf16.msra.mxu0 %v2501_v18 }
  0xd1   :  { %1021 = vmatmul.mubr.msk.f32.vlgmr.msra.gmra.mrb[8].mxu0 %vm31_vm4, %v2466_v22 }
  0xd2   :  { %1022 = vmatprep.mubr.msk.f32.mxu0 %vm34_vm7, %v2466_v22 }
  0xd5   :  { %1023 = vmatmul.mubr.msk.f32.gmra.mrb[10].mxu0 %vm33_vm6, %v2466_v22 }
 0x15b   :  { %v1098_v62 = vpop.f32.mrb[0].mxu1 }
 0x15c   :  { %v1099_v7 = vpop.f32.mrb[1].mxu1 }
 0x15d   :  { %v1100_v55 = vadd.f32 %v1099_v7, %v1098_v62 }
 0x15f   :  { %v1101_v54 = vpop.f32.mrb[2].mxu1 }
 0x160   :  { %v1102_v27 = vpop.f32.mrb[3].mxu1 }
 0x161   :  { %v1103_v25 = vadd.f32 %v1102_v27, %v1101_v54 }
 0x164   :  { %v1060_v2 = vpop.f32.mrb[0].mxu0 }
 0x165   :  { %v1061_v59 = vpop.f32.mrb[1].mxu0 }
 0x166   :  { %v1062_v58 = vadd.f32 %v1061_v59, %v1060_v2 }
 0x168   :  { %v431_v34 = vadd.f32 %v1100_v55, %v1062_v58  ;;  %v1063_v42 = vpop.f32.mrb[2].mxu0 }
 0x169   :  { %v1064_v41 = vpop.f32.mrb[3].mxu0 }
 0x16a   :  { %v1065_v4 = vadd.f32 %v1064_v41, %v1063_v42 }
 0x16c   :  { %v438_v31 = vadd.f32 %v1103_v25, %v1065_v4 }
 0x17b   :  { %v1174_v30 = vpop.f32.mrb[4].mxu1 }
 0x17c   :  { %v1175_v63 = vpop.f32.mrb[5].mxu1 }
 0x17d   :  { %v1176_v49 = vadd.f32 %v1175_v63, %v1174_v30 }
 0x17f   :  { %v1177_v48 = vpop.f32.mrb[6].mxu1 }
 0x180   :  { %v1178_v29 = vpop.f32.mrb[7].mxu1 }
 0x181   :  { %v1179_v22 = vadd.f32 %v1178_v29, %v1177_v48 }
 0x184   :  { %v1136_v45 = vpop.f32.mrb[4].mxu0 }
 0x185   :  { %v1137_v56 = vpop.f32.mrb[5].mxu0 }
 0x186   :  { %v1138_v46 = vadd.f32 %v1137_v56, %v1136_v45 }
 0x188   :  { %v576_v51 = vadd.f32 %v1138_v46, %v431_v34  ;;  %v1139_v5 = vpop.f32.mrb[6].mxu0 }
 0x189   :  { %v1140_v47 = vpop.f32.mrb[7].mxu0 }
 0x18a   :  { %v1141_v20 = vadd.f32 %v1140_v47, %v1139_v5  ;;  %v693_v19 = vadd.f32 %v1176_v49, %v576_v51 }
 0x18c   :  { %v585_v43 = vadd.f32 %v1141_v20, %v438_v31 }
 0x18e   :  { %v704_v14 = vadd.f32 %v1179_v22, %v585_v43 }
 0x19b   :  { %v1250_v17 = vpop.f32.mrb[8].mxu1 }
 0x19c   :  { %v1251_v35 = vpop.f32.mrb[9].mxu1 }
 0x19d   :  { %v1252_v15 = vadd.f32 %v1251_v35, %v1250_v17 }
 0x19f   :  { %v1253_v11 = vpop.f32.mrb[10].mxu1 }
 0x1a0   :  { %v1254_v38 = vpop.f32.mrb[11].mxu1 }
 0x1a1   :  { %v1255_v21 = vadd.f32 %v1254_v38, %v1253_v11 }
 0x1a4   :  { %v1212_v23 = vpop.f32.mrb[8].mxu0 }
 0x1a5   :  { %v1213_v32 = vpop.f32.mrb[9].mxu0 }
 0x1a6   :  { %v1214_v33 = vadd.f32 %v1213_v32, %v1212_v23 }
 0x1a8   :  { %v872_v13 = vadd.f32 %v1214_v33, %v693_v19  ;;  %v1215_v36 = vpop.f32.mrb[10].mxu0 }
 0x1a9   :  { %v1216_v37 = vpop.f32.mrb[11].mxu0 }
 0x1aa   :  { %v983_v61 = vadd.f32 %v1252_v15, %v872_v13  ;;  %v1217_v1 = vadd.f32 %v1216_v37, %v1215_v36 }
 0x1ac   :  { %994 = vst.msk [vmem:[#allocation2] sm:$0xff] %vm993_vm8, %v983_v61  ;;  %v879_v39 = vadd.f32 %v1217_v1, %v704_v14 }
 0x1ae   :  { %v990_v6 = vadd.f32 %v1255_v21, %v879_v39 }
 0x1b0   :  { %995 = vst.msk [vmem:[#allocation2 + $0x8] sm:$0xff] %vm993_vm8, %v990_v6 }
 0x1b1   :  { %1466 = shalt.err (!%p1463_p4)
}
 0x1b2   :  { %s1467_s22 = scalar_lea.hbm %s2359_s2, 256 }
 0x1b3   :  { %p1468_p5 = scmp.ne.s32.totalorder %s2359_s2, %s1467_s22  ;;  %p1471_p6 = scmp.lt.u32.totalorder %s1467_s22, %s2359_s2 }
 0x1b5   :  { %p1473_p7 = pnand %p1471_p6, %p1468_p5 }
 0x1b7   :  { %1476 = shalt.err (!%p1473_p7)
}
 0x1b8   :  { %s1483_s27 = smov 128   ;;  %s1484_s28 = smov 8  }
 0x1b9   :  { %1007 = dma.vmem_to_hbm [thread:$0]  %s1002_s0, 256, %s2359_s2, [#allocation3], %s1483_s27, %s1483_s27, %s1484_s28  }
 0x1ba   :  { %1477 = dma.done.wait [#allocation3], 256  }
 0x1bb   :  { %1478 = vsyncadd [#allocation3], 4294967040 }
 0x1bc   :  { %1011 = vsyncpa [#allocation3], 1 }

</bundles_post_ra>
